<compile_context>
chip_gen: v6e
topology: v6e:2x2x1
jax: 0.10.0
libtpu: 0.0.40
codegen_flags: <defaults>
</compile_context>

<pallas_src>
import functools
import inspect
import math

import jax
import jax.numpy as jnp
from jax.experimental import pallas as pl
from jax.experimental.pallas import tpu as pltpu

MXU_DTYPE = jnp.bfloat16   # matmul-operand dtype (accumulation is always f32)


# --------------------------------------------------------------------------------------
# Kernel
# --------------------------------------------------------------------------------------
def svd_attention_kernel(
    # inputs
    x_ref,      # (1, S, D)  bf16 full-sequence input block for one batch element
    svd_ref,    # (1, D)     f32 precomputed SVD-adaptation bias vector
    p1w_ref,    # (D//2, D)  bf16 proj1 weight (in, out)
    p1b_ref,    # (1, D)     f32 proj1 bias
    p2w_ref,    # (D//2, D)  bf16 proj2 weight
    p2b_ref,    # (1, D)     f32 proj2 bias
    wq1_ref,    # (D, D)     bf16 to_qkv1 Q columns (scale pre-folded)
    wk1_ref,    # (D, D)     bf16 to_qkv1 K columns
    wv1_ref,    # (D, D)     bf16 to_qkv1 V columns
    wq2_ref,    # (D, D)     bf16 to_qkv2 Q columns (scale pre-folded)
    wk2_ref,    # (D, D)     bf16 to_qkv2 K columns
    wv2_ref,    # (D, D)     bf16 to_qkv2 V columns
    ow_ref,     # (D, D)     bf16 to_out[0] weight
    ob_ref,     # (1, D)     f32 to_out[0] bias
    lng_ref,    # (1, D)     f32 LayerNorm gamma
    lnb_ref,    # (1, D)     f32 LayerNorm beta
    # outputs
    o_ref,      # (1, TQ, D) output block (one query tile)
    # scratch (persists across the qi grid axis; recomputed at qi == 0 for each b)
    q1s_ref,    # (S, D) bf16 branch-1 Q (scale already folded into the weights)
    q2s_ref,    # (S, D) bf16
    k1s_ref,    # (S, D) bf16
    k2s_ref,    # (S, D) bf16
    va_ref,     # (S, D) bf16 pre-averaged V = 0.5 * (V1 + V2)
    hacc_ref,   # (TQ, D) bf16 concatenated per-head outputs for this query tile
    *,
    dim, num_heads, d_head, heads_per_group, q_tile, num_q_tiles, eps,
):
    qi = pl.program_id(1)
    half = dim // 2
    group_w = heads_per_group * d_head
    n_groups = num_heads // heads_per_group

    # ---- once per batch element: full-sequence projections -> Q/K/V scratch ----
    @pl.when(qi == 0)
    def _compute_qkv():
        xf = x_ref[0].astype(jnp.float32)                       # (S, D)
        adapted = xf + svd_ref[0][None, :]                      # SVD adaptation (f32)
        x1 = (jnp.dot(adapted[:, :half].astype(MXU_DTYPE), p1w_ref[...],
                      preferred_element_type=jnp.float32)
              + p1b_ref[0][None, :]).astype(MXU_DTYPE)          # (S, D) bf16
        x2 = (jnp.dot(adapted[:, half:].astype(MXU_DTYPE), p2w_ref[...],
                      preferred_element_type=jnp.float32)
              + p2b_ref[0][None, :]).astype(MXU_DTYPE)
        # Column-split QKV matmuls; each f32 result is cast and stored straight to bf16
        # scratch, so at most one (S, D) f32 temporary is live at a time (no (S,3D) slab).
        q1s_ref[...] = jnp.dot(x1, wq1_ref[...],
                               preferred_element_type=jnp.float32).astype(MXU_DTYPE)
        q2s_ref[...] = jnp.dot(x2, wq2_ref[...],
                               preferred_element_type=jnp.float32).astype(MXU_DTYPE)
        k1s_ref[...] = jnp.dot(x1, wk1_ref[...],
                               preferred_element_type=jnp.float32).astype(MXU_DTYPE)
        k2s_ref[...] = jnp.dot(x2, wk2_ref[...],
                               preferred_element_type=jnp.float32).astype(MXU_DTYPE)
        v1 = jnp.dot(x1, wv1_ref[...], preferred_element_type=jnp.float32)
        v2 = jnp.dot(x2, wv2_ref[...], preferred_element_type=jnp.float32)
        # diff @ v_avg == 0.5 * (diff @ v1 + diff @ v2)
        va_ref[...] = (0.5 * (v1 + v2)).astype(MXU_DTYPE)

    # ---- per query tile ----
    if num_q_tiles == 1:
        row0 = 0
    else:
        row0 = pl.multiple_of(qi * q_tile, q_tile)

    contract_last = (((1,), (1,)), ((), ()))   # q @ k^T without an explicit transpose

    def softmax(s):
        m = jnp.max(s, axis=-1, keepdims=True)
        e = jnp.exp(s - m)
        # exact per-row reciprocal: only (rows, 1) elements -> negligible cost, and it
        # matches the module's softmax precision (the approx EUP reciprocal cost us a
        # precision-check failure previously).
        return e * (1.0 / jnp.sum(e, axis=-1, keepdims=True))

    def process_group(g0):
        # g0: column offset of this head group (multiple of group_w, lane-dense in
        # production shapes where group_w is a multiple of 128).
        q1g = q1s_ref[pl.ds(row0, q_tile), pl.ds(g0, group_w)]   # (TQ, GW) bf16
        q2g = q2s_ref[pl.ds(row0, q_tile), pl.ds(g0, group_w)]
        k1g = k1s_ref[:, pl.ds(g0, group_w)]                     # (S, GW) bf16
        k2g = k2s_ref[:, pl.ds(g0, group_w)]
        vag = va_ref[:, pl.ds(g0, group_w)]
        outs = []
        for h in range(heads_per_group):
            lo = h * d_head
            hi = lo + d_head
            s1 = jax.lax.dot_general(q1g[:, lo:hi], k1g[:, lo:hi], contract_last,
                                     preferred_element_type=jnp.float32)   # (TQ, S)
            s2 = jax.lax.dot_general(q2g[:, lo:hi], k2g[:, lo:hi], contract_last,
                                     preferred_element_type=jnp.float32)
            # TODO(synk): attention-map dropout omitted (identity in eval mode).
            diff = (softmax(s1) - softmax(s2)).astype(MXU_DTYPE)
            outs.append(jnp.dot(diff, vag[:, lo:hi],
                                preferred_element_type=jnp.float32))        # (TQ, dh)
        group_out = outs[0] if len(outs) == 1 else jnp.concatenate(outs, axis=-1)
        # One lane-dense bf16 store per head group.
        hacc_ref[:, pl.ds(g0, group_w)] = group_out.astype(MXU_DTYPE)

    if n_groups == 1:
        process_group(0)
    else:
        # fori_loop bounds the live (TQ, S) softmax intermediates to one head group.
        def body(g, carry):
            process_group(pl.multiple_of(g * group_w, group_w))
            return carry
        jax.lax.fori_loop(0, n_groups, body, 0)

    # Single K=D output projection over the concatenated heads (bf16 operands).
    proj = jnp.dot(hacc_ref[...], ow_ref[...],
                   preferred_element_type=jnp.float32) + ob_ref[0][None, :]

    # LayerNorm over the feature dim (f32, exact per-row rsqrt via sqrt+divide).
    mean = jnp.mean(proj, axis=-1, keepdims=True)
    var = jnp.mean(jnp.square(proj - mean), axis=-1, keepdims=True)
    inv = 1.0 / jnp.sqrt(var + eps)
    out = (proj - mean) * inv * lng_ref[0][None, :] + lnb_ref[0][None, :]

    o_ref[0] = out.astype(o_ref.dtype)


# --------------------------------------------------------------------------------------
# Trace-time helpers
# --------------------------------------------------------------------------------------
def _svd_bias_vector(params, z_vector=None):
    """sigma * (U @ V) (optionally z-scaled) summed over the last dim -> (1, D) f32."""
    U, V = params["U"], params["V"]
    if z_vector is None:
        m = params["sigma"] * (U @ V)
    else:
        rank = U.shape[1]
        z = z_vector[:rank].reshape(1, -1)
        m = U @ ((params["sigma"] * z)[..., None] * V)[0]
    D = U.shape[0]
    return m.sum(axis=-1).reshape(1, D).astype(jnp.float32)


def _preprocess_params(params, *, num_heads, z_vector=None):
    """Trace-time parameter prep: fold the attention scale into the Q columns, split the
    QKV weights into separate (D, D) matrices, cast matmul weights to bf16."""
    D = params["qkv1w"].shape[0]
    d_head = D // num_heads
    scale = 1.0 / math.sqrt(d_head)
    w1, w2 = params["qkv1w"], params["qkv2w"]
    return {
        "svd_vec": _svd_bias_vector(params, z_vector),
        "p1w": params["p1w"].astype(MXU_DTYPE),
        "p1b": params["p1b"].astype(jnp.float32),
        "p2w": params["p2w"].astype(MXU_DTYPE),
        "p2b": params["p2b"].astype(jnp.float32),
        "wq1": (w1[:, :D] * scale).astype(MXU_DTYPE),
        "wk1": w1[:, D:2 * D].astype(MXU_DTYPE),
        "wv1": w1[:, 2 * D:].astype(MXU_DTYPE),
        "wq2": (w2[:, :D] * scale).astype(MXU_DTYPE),
        "wk2": w2[:, D:2 * D].astype(MXU_DTYPE),
        "wv2": w2[:, 2 * D:].astype(MXU_DTYPE),
        "outw": params["outw"].astype(MXU_DTYPE),
        "outb": params["outb"].astype(jnp.float32),
        "ln_g": params["ln_g"].astype(jnp.float32),
        "ln_b": params["ln_b"].astype(jnp.float32),
    }


def _target_q_tile():
    # v5e's MXU is 128-wide -> TQ=128 already fills it; v6e/v7x have 256-wide MXUs.
    try:
        kind = jax.devices()[0].device_kind.lower()
    except Exception:
        return 256
    if "v5e" in kind or "v5 lite" in kind or "v5lite" in kind:
        return 128
    return 256


def _pick_q_tile(S, target):
    if S <= target:
        return S
    t = (min(S, target) // 8) * 8
    while t >= 8:
        if S % t == 0:
            return t
        t -= 8
    # TODO(synk): pad-and-mask the query axis for S not divisible by 8.
    return S


def _heads_per_group(num_heads, d_head):
    """Largest divisor of num_heads whose combined width is ~128 lanes (lane-dense)."""
    if d_head >= 128:
        return 1
    hpg = min(num_heads, max(1, 128 // d_head))
    while num_heads % hpg:
        hpg -= 1
    return hpg


def _chip_vmem_budget_bytes():
    """Usable VMEM budget (with headroom); conservative default when the query fails."""
    try:
        cap = int(pltpu.get_tpu_info().vmem_capacity_bytes)
    except Exception:
        cap = 0
    if cap < 16 * 2**20:
        cap = 64 * 2**20   # v7x per-TensorCore VMEM; a safe lower bound everywhere
    return int(cap * 0.85)


@functools.lru_cache(maxsize=None)
def _single_buffer_supported():
    """Explicit feature detection for BlockSpec(pipeline_mode=pl.Buffered(1)).

    A tiny probe kernel is compiled once so that a Mosaic rejection of single buffering
    is caught here rather than being masked by (or crashing) the real build.
    """
    if not hasattr(pl, "Buffered"):
        return False
    try:
        if "pipeline_mode" not in inspect.signature(pl.BlockSpec).parameters:
            return False
    except (TypeError, ValueError):
        return False

    def _probe_kernel(w_ref, o_ref):
        o_ref[...] = w_ref[...] * 2.0

    try:
        probe = pl.pallas_call(
            _probe_kernel,
            out_shape=jax.ShapeDtypeStruct((8, 128), jnp.float32),
            grid=(2,),
            in_specs=[pl.BlockSpec((8, 128), lambda i: (0, 0),
                                   pipeline_mode=pl.Buffered(buffer_count=1))],
            out_specs=pl.BlockSpec((8, 128), lambda i: (0, 0)),
        )
        jax.jit(probe).lower(jnp.zeros((8, 128), jnp.float32)).compile()
        return True
    except Exception:
        return False


# --------------------------------------------------------------------------------------
# Wrapper
# --------------------------------------------------------------------------------------
def svd_attention_forward(x, params, *, num_heads, z_vector=None):
    B, S, D = x.shape
    assert D % num_heads == 0
    d_head = D // num_heads
    half = D // 2
    tq = _pick_q_tile(S, _target_q_tile())
    nq = S // tq
    hpg = _heads_per_group(num_heads, d_head)

    pp = _preprocess_params(params, num_heads=num_heads, z_vector=z_vector)
    x_in = x.astype(MXU_DTYPE)   # bf16 input: halves the only large HBM DMA + VMEM block

    kernel = functools.partial(
        svd_attention_kernel,
        dim=D, num_heads=num_heads, d_head=d_head, heads_per_group=hpg,
        q_tile=tq, num_q_tiles=nq, eps=1e-5,
    )

    operands = (
        x_in, pp["svd_vec"],
        pp["p1w"], pp["p1b"], pp["p2w"], pp["p2b"],
        pp["wq1"], pp["wk1"], pp["wv1"], pp["wq2"], pp["wk2"], pp["wv2"],
        pp["outw"], pp["outb"], pp["ln_g"], pp["ln_b"],
    )

    single_buffer = _single_buffer_supported()

    # --- VMEM accounting (including in-kernel temporaries) and chip-aware budget ---
    param_bytes = sum(int(a.size) * a.dtype.itemsize for a in operands[1:])
    weight_bytes = param_bytes * (1 if single_buffer else 2)
    x_block_bytes = 2 * S * D * x_in.dtype.itemsize        # double-buffered bf16 block
    out_block_bytes = 2 * tq * D * x.dtype.itemsize
    scratch_bytes = 5 * S * D * 2 + tq * D * 2              # bf16 Q/K/V/hacc scratch
    phase1_tmp = 6 * S * D * 4                               # adapted/x1/x2/one f32 result
    attn_tmp = 8 * tq * S * 4                                # per-group score/softmax temps
    needed = (weight_bytes + x_block_bytes + out_block_bytes
              + scratch_bytes + phase1_tmp + attn_tmp)
    budget = _chip_vmem_budget_bytes()
    if needed > budget:
        raise ValueError(
            f"SVDAttention resident-scratch kernel needs ~{needed >> 20} MiB VMEM but the "
            f"chip budget is ~{budget >> 20} MiB; reduce S*D or use the flash-style "
            f"KV-tiled variant.  # TODO(synk)")
    vmem_limit = int(min(budget, max(32 * 2**20, 1.2 * needed)))

    flops = int(B * (16 * S * D * D + 6 * S * S * D))
    cost = pl.CostEstimate(
        flops=flops,
        transcendentals=int(2 * B * num_heads * S * S),
        bytes_accessed=int(param_bytes + B * S * D * (x_in.dtype.itemsize
                                                      + x.dtype.itemsize)),
    )

    def const_spec(shape):
        kwargs = {}
        if single_buffer:
            # Constant-index-map inputs: keep a single VMEM copy (no double buffering).
            kwargs["pipeline_mode"] = pl.Buffered(buffer_count=1)
        return pl.BlockSpec(shape, lambda b, qi: (0,) * len(shape), **kwargs)

    out = pl.pallas_call(
        kernel,
        out_shape=jax.ShapeDtypeStruct((B, S, D), x.dtype),
        grid_spec=pltpu.PrefetchScalarGridSpec(
            num_scalar_prefetch=0,
            grid=(B, nq),
            in_specs=[
                pl.BlockSpec((1, S, D), lambda b, qi: (b, 0, 0)),   # x (full seq per b)
                const_spec((1, D)),          # svd_vec
                const_spec((half, D)),       # proj1 W
                const_spec((1, D)),          # proj1 b
                const_spec((half, D)),       # proj2 W
                const_spec((1, D)),          # proj2 b
                const_spec((D, D)),          # Wq1 (scale folded)
                const_spec((D, D)),          # Wk1
                const_spec((D, D)),          # Wv1
                const_spec((D, D)),          # Wq2 (scale folded)
                const_spec((D, D)),          # Wk2
                const_spec((D, D)),          # Wv2
                const_spec((D, D)),          # to_out W
                const_spec((1, D)),          # to_out b
                const_spec((1, D)),          # LN gamma
                const_spec((1, D)),          # LN beta
            ],
            out_specs=pl.BlockSpec((1, tq, D), lambda b, qi: (b, qi, 0)),
            scratch_shapes=[
                pltpu.VMEM((S, D), MXU_DTYPE),   # Q1
                pltpu.VMEM((S, D), MXU_DTYPE),   # Q2
                pltpu.VMEM((S, D), MXU_DTYPE),   # K1
                pltpu.VMEM((S, D), MXU_DTYPE),   # K2
                pltpu.VMEM((S, D), MXU_DTYPE),   # V averaged
                pltpu.VMEM((tq, D), MXU_DTYPE),  # concatenated head outputs
            ],
        ),
        compiler_params=pltpu.CompilerParams(
            dimension_semantics=("parallel", "arbitrary"),
            vmem_limit_bytes=vmem_limit,
        ),
        cost_estimate=cost,
    )(*operands)
    return out, None


# --------------------------------------------------------------------------------------
# Pure-JAX references
# --------------------------------------------------------------------------------------
def reference_forward(x, params, *, num_heads, matmul_dtype=jnp.float32):
    """Mirrors the PyTorch module (eval mode).  `matmul_dtype=bf16` is a precision-matched
    reference for the kernel (every bf16 rounding point matches); f32 reproduces the
    module exactly."""
    B, S, D = x.shape
    H = num_heads
    dh = D // H
    scale = 1.0 / math.sqrt(dh)
    half = D // 2
    md = jnp.dtype(matmul_dtype)

    def mm(a, b):
        return jnp.dot(a.astype(md), b.astype(md), preferred_element_type=jnp.float32)

    xq = x.astype(jnp.float32)
    if md != jnp.dtype(jnp.float32):
        xq = x.astype(md).astype(jnp.float32)   # mirror the wrapper's bf16 input cast

    svd_vec = params["sigma"] * (params["U"] @ params["V"]).sum(axis=-1)   # (D,)
    adapted = xq + svd_vec[None, None, :]
    x1 = mm(adapted[..., :half], params["p1w"]) + params["p1b"][0]
    x2 = mm(adapted[..., half:], params["p2w"]) + params["p2b"][0]

    # Same scale-folding as the kernel wrapper (exact in f32, rounded once to bf16 in mm).
    w1 = jnp.concatenate([params["qkv1w"][:, :D] * scale, params["qkv1w"][:, D:]], axis=-1)
    w2 = jnp.concatenate([params["qkv2w"][:, :D] * scale, params["qkv2w"][:, D:]], axis=-1)
    qkv1 = mm(x1, w1)
    qkv2 = mm(x2, w2)

    def heads(t):   # (B,S,D) -> (B,H,S,dh)
        return t.reshape(B, S, H, dh).transpose(0, 2, 1, 3)

    q1, k1, v1 = (heads(t) for t in jnp.split(qkv1, 3, axis=-1))
    q2, k2, v2 = (heads(t) for t in jnp.split(qkv2, 3, axis=-1))
    v_avg = 0.5 * (v1 + v2)

    def scores(q, k):
        return jnp.einsum("bhqd,bhkd->bhqk", q.astype(md), k.astype(md),
                          preferred_element_type=jnp.float32)

    a1 = jax.nn.softmax(scores(q1, k1), axis=-1)
    a2 = jax.nn.softmax(scores(q2, k2), axis=-1)
    diff = a1 - a2                       # attention-map dropout is identity in eval mode
    out = jnp.einsum("bhqk,bhkd->bhqd", diff.astype(md), v_avg.astype(md),
                     preferred_element_type=jnp.float32)
    out = out.transpose(0, 2, 1, 3).reshape(B, S, D)
    out = mm(out, params["outw"]) + params["outb"][0]
    mean = out.mean(-1, keepdims=True)
    var = ((out - mean) ** 2).mean(-1, keepdims=True)
    out = (out - mean) / jnp.sqrt(var + 1e-5)
    return out * params["ln_g"][0] + params["ln_b"][0]


def init_params(key, dim, rank):
    ks = jax.random.split(key, 10)
    half = dim // 2
    s = lambda fan_in: 1.0 / math.sqrt(fan_in)
    return {
        "sigma": jnp.float32(0.1),
        "U": jax.random.normal(ks[0], (dim, rank), jnp.float32),
        "V": jax.random.normal(ks[1], (rank, dim), jnp.float32),
        "p1w": jax.random.normal(ks[2], (half, dim), jnp.float32) * s(half),
        "p1b": jax.random.normal(ks[3], (1, dim), jnp.float32) * 0.02,
        "p2w": jax.random.normal(ks[4], (half, dim), jnp.float32) * s(half),
        "p2b": jax.random.normal(ks[5], (1, dim), jnp.float32) * 0.02,
        "qkv1w": jax.random.normal(ks[6], (dim, 3 * dim), jnp.float32) * s(dim),
        "qkv2w": jax.random.normal(ks[7], (dim, 3 * dim), jnp.float32) * s(dim),
        "outw": jax.random.normal(ks[8], (dim, dim), jnp.float32) * s(dim),
        "outb": jax.random.normal(ks[9], (1, dim), jnp.float32) * 0.02,
        "ln_g": jnp.ones((1, dim), jnp.float32),
        "ln_b": jnp.zeros((1, dim), jnp.float32),
    }


if __name__ == "__main__":
    B, S, D, H, RANK = 2, 8, 32, 8, 4

    key = jax.random.PRNGKey(0)
    kx, kp = jax.random.split(key)
    x = jax.random.normal(kx, (B, S, D), jnp.float32)
    params = init_params(kp, D, RANK)

    out, _ = svd_attention_forward(x, params, num_heads=H)
    out = jax.block_until_ready(out)
    assert out.shape == (B, S, D)
    assert out.dtype == x.dtype

    # 1) Precision-matched reference (bf16 matmul operands, f32 accumulation, bf16 input):
    #    validates the kernel implementation.  The tolerance accounts for the fact that
    #    the differential attention is a difference of near-equal softmax maps and the
    #    trailing LayerNorm rescales to unit variance, amplifying tiny precision deltas.
    ref_bf16 = reference_forward(x, params, num_heads=H, matmul_dtype=MXU_DTYPE)
    err_matched = float(jnp.max(jnp.abs(out - ref_bf16)))
    assert err_matched < 8e-2, err_matched

    # 2) Full-f32 reference (mirrors the PyTorch module): loose bound on the bf16-vs-f32
    #    numerical gap.
    ref_f32 = reference_forward(x, params, num_heads=H, matmul_dtype=jnp.float32)
    assert jnp.allclose(out, ref_f32, atol=0.3, rtol=0.05), (
        float(jnp.max(jnp.abs(out - ref_f32))))

    print("KERNEL_OK")
</pallas_src>

<mosaic_0001>
module attributes {stable_mosaic.version = 11 : i64} {
  func.func @svd_attention_kernel(%arg0: i32, %arg1: i32, %arg2: memref<1x8x32xbf16, #tpu.memory_space<vmem>>, %arg3: memref<1x32xf32, #tpu.memory_space<vmem>>, %arg4: memref<16x32xbf16, #tpu.memory_space<vmem>>, %arg5: memref<1x32xf32, #tpu.memory_space<vmem>>, %arg6: memref<16x32xbf16, #tpu.memory_space<vmem>>, %arg7: memref<1x32xf32, #tpu.memory_space<vmem>>, %arg8: memref<32x32xbf16, #tpu.memory_space<vmem>>, %arg9: memref<32x32xbf16, #tpu.memory_space<vmem>>, %arg10: memref<32x32xbf16, #tpu.memory_space<vmem>>, %arg11: memref<32x32xbf16, #tpu.memory_space<vmem>>, %arg12: memref<32x32xbf16, #tpu.memory_space<vmem>>, %arg13: memref<32x32xbf16, #tpu.memory_space<vmem>>, %arg14: memref<32x32xbf16, #tpu.memory_space<vmem>>, %arg15: memref<1x32xf32, #tpu.memory_space<vmem>>, %arg16: memref<1x32xf32, #tpu.memory_space<vmem>>, %arg17: memref<1x32xf32, #tpu.memory_space<vmem>>, %arg18: memref<1x8x32xf32, #tpu.memory_space<vmem>>, %arg19: memref<8x32xbf16, #tpu.memory_space<vmem>>, %arg20: memref<8x32xbf16, #tpu.memory_space<vmem>>, %arg21: memref<8x32xbf16, #tpu.memory_space<vmem>>, %arg22: memref<8x32xbf16, #tpu.memory_space<vmem>>, %arg23: memref<8x32xbf16, #tpu.memory_space<vmem>>, %arg24: memref<8x32xbf16, #tpu.memory_space<vmem>>) attributes {dimension_semantics = [#tpu.dimension_semantics<parallel>, #tpu.dimension_semantics<arbitrary>], iteration_bounds = array<i64: 2, 1>, scalar_prefetch = 0 : i64, scratch_operands = 6 : i64, tpu.core_type = #tpu.core_type<tc>, window_params = [{transform_indices = @transform_0, window_bounds = array<i64: 1, 8, 32>}, {pipeline_mode = #tpu.pipeline_mode<synchronous>, transform_indices = @transform_1, window_bounds = array<i64: 1, 32>}, {pipeline_mode = #tpu.pipeline_mode<synchronous>, transform_indices = @transform_2, window_bounds = array<i64: 16, 32>}, {pipeline_mode = #tpu.pipeline_mode<synchronous>, transform_indices = @transform_3, window_bounds = array<i64: 1, 32>}, {pipeline_mode = #tpu.pipeline_mode<synchronous>, transform_indices = @transform_4, window_bounds = array<i64: 16, 32>}, {pipeline_mode = #tpu.pipeline_mode<synchronous>, transform_indices = @transform_5, window_bounds = array<i64: 1, 32>}, {pipeline_mode = #tpu.pipeline_mode<synchronous>, transform_indices = @transform_6, window_bounds = array<i64: 32, 32>}, {pipeline_mode = #tpu.pipeline_mode<synchronous>, transform_indices = @transform_7, window_bounds = array<i64: 32, 32>}, {pipeline_mode = #tpu.pipeline_mode<synchronous>, transform_indices = @transform_8, window_bounds = array<i64: 32, 32>}, {pipeline_mode = #tpu.pipeline_mode<synchronous>, transform_indices = @transform_9, window_bounds = array<i64: 32, 32>}, {pipeline_mode = #tpu.pipeline_mode<synchronous>, transform_indices = @transform_10, window_bounds = array<i64: 32, 32>}, {pipeline_mode = #tpu.pipeline_mode<synchronous>, transform_indices = @transform_11, window_bounds = array<i64: 32, 32>}, {pipeline_mode = #tpu.pipeline_mode<synchronous>, transform_indices = @transform_12, window_bounds = array<i64: 32, 32>}, {pipeline_mode = #tpu.pipeline_mode<synchronous>, transform_indices = @transform_13, window_bounds = array<i64: 1, 32>}, {pipeline_mode = #tpu.pipeline_mode<synchronous>, transform_indices = @transform_14, window_bounds = array<i64: 1, 32>}, {pipeline_mode = #tpu.pipeline_mode<synchronous>, transform_indices = @transform_15, window_bounds = array<i64: 1, 32>}, {transform_indices = @transform_16, window_bounds = array<i64: 1, 8, 32>}]} {
    %c0_i32 = arith.constant 0 : i32
    %0 = arith.cmpi eq, %arg1, %c0_i32 : i32
    %1 = arith.extui %0 : i1 to i32
    %c0_i32_0 = arith.constant 0 : i32
    %2 = arith.cmpi ne, %1, %c0_i32_0 : i32
    scf.if %2 {
      %c0_103 = arith.constant 0 : index
      %c0_104 = arith.constant 0 : index
      %c0_105 = arith.constant 0 : index
      %308 = vector.load %arg2[%c0_103, %c0_104, %c0_105] : memref<1x8x32xbf16, #tpu.memory_space<vmem>>, vector<1x8x32xbf16>
      %309 = vector.shape_cast %308 : vector<1x8x32xbf16> to vector<8x32xbf16>
      %310 = arith.extf %309 : vector<8x32xbf16> to vector<8x32xf32>
      %c0_106 = arith.constant 0 : index
      %c0_107 = arith.constant 0 : index
      %311 = vector.load %arg3[%c0_106, %c0_107] : memref<1x32xf32, #tpu.memory_space<vmem>>, vector<1x32xf32>
      %312 = vector.shape_cast %311 : vector<1x32xf32> to vector<32xf32>
      %313 = vector.shape_cast %312 : vector<32xf32> to vector<1x32xf32>
      %314 = vector.broadcast %313 : vector<1x32xf32> to vector<8x32xf32>
      %315 = arith.addf %310, %314 : vector<8x32xf32>
      %316 = vector.extract_strided_slice %315 {offsets = [0, 0], sizes = [8, 16], strides = [1, 1]} : vector<8x32xf32> to vector<8x16xf32>
      %317 = arith.truncf %316 : vector<8x16xf32> to vector<8x16xbf16>
      %c0_108 = arith.constant 0 : index
      %c0_109 = arith.constant 0 : index
      %318 = vector.load %arg4[%c0_108, %c0_109] : memref<16x32xbf16, #tpu.memory_space<vmem>>, vector<16x32xbf16>
      %cst_110 = arith.constant dense<0.000000e+00> : vector<8x32xf32>
      %319 = tpu.matmul %317, %318, %cst_110 {dimension_numbers = #tpu.dot_dimension_numbers<[1], [0], [0], [1], [0, 0, 1, 1], [], []>} : vector<8x16xbf16>, vector<16x32xbf16>, vector<8x32xf32> -> vector<8x32xf32>
      %c0_111 = arith.constant 0 : index
      %c0_112 = arith.constant 0 : index
      %320 = vector.load %arg5[%c0_111, %c0_112] : memref<1x32xf32, #tpu.memory_space<vmem>>, vector<1x32xf32>
      %321 = vector.shape_cast %320 : vector<1x32xf32> to vector<32xf32>
      %322 = vector.shape_cast %321 : vector<32xf32> to vector<1x32xf32>
      %323 = vector.broadcast %322 : vector<1x32xf32> to vector<8x32xf32>
      %324 = arith.addf %319, %323 : vector<8x32xf32>
      %325 = arith.truncf %324 : vector<8x32xf32> to vector<8x32xbf16>
      %326 = vector.extract_strided_slice %315 {offsets = [0, 16], sizes = [8, 16], strides = [1, 1]} : vector<8x32xf32> to vector<8x16xf32>
      %327 = arith.truncf %326 : vector<8x16xf32> to vector<8x16xbf16>
      %c0_113 = arith.constant 0 : index
      %c0_114 = arith.constant 0 : index
      %328 = vector.load %arg6[%c0_113, %c0_114] : memref<16x32xbf16, #tpu.memory_space<vmem>>, vector<16x32xbf16>
      %cst_115 = arith.constant dense<0.000000e+00> : vector<8x32xf32>
      %329 = tpu.matmul %327, %328, %cst_115 {dimension_numbers = #tpu.dot_dimension_numbers<[1], [0], [0], [1], [0, 0, 1, 1], [], []>} : vector<8x16xbf16>, vector<16x32xbf16>, vector<8x32xf32> -> vector<8x32xf32>
      %c0_116 = arith.constant 0 : index
      %c0_117 = arith.constant 0 : index
      %330 = vector.load %arg7[%c0_116, %c0_117] : memref<1x32xf32, #tpu.memory_space<vmem>>, vector<1x32xf32>
      %331 = vector.shape_cast %330 : vector<1x32xf32> to vector<32xf32>
      %332 = vector.shape_cast %331 : vector<32xf32> to vector<1x32xf32>
      %333 = vector.broadcast %332 : vector<1x32xf32> to vector<8x32xf32>
      %334 = arith.addf %329, %333 : vector<8x32xf32>
      %335 = arith.truncf %334 : vector<8x32xf32> to vector<8x32xbf16>
      %c0_118 = arith.constant 0 : index
      %c0_119 = arith.constant 0 : index
      %336 = vector.load %arg8[%c0_118, %c0_119] : memref<32x32xbf16, #tpu.memory_space<vmem>>, vector<32x32xbf16>
      %cst_120 = arith.constant dense<0.000000e+00> : vector<8x32xf32>
      %337 = tpu.matmul %325, %336, %cst_120 {dimension_numbers = #tpu.dot_dimension_numbers<[1], [0], [0], [1], [0, 0, 1, 1], [], []>} : vector<8x32xbf16>, vector<32x32xbf16>, vector<8x32xf32> -> vector<8x32xf32>
      %338 = arith.truncf %337 : vector<8x32xf32> to vector<8x32xbf16>
      %c0_121 = arith.constant 0 : index
      %c0_122 = arith.constant 0 : index
      %339 = vector.load %arg19[%c0_121, %c0_122] : memref<8x32xbf16, #tpu.memory_space<vmem>>, vector<8x32xbf16>
      tpu.vector_store %arg19[%c0_121, %c0_122], %338 {strides = array<i32>} : memref<8x32xbf16, #tpu.memory_space<vmem>>, vector<8x32xbf16>,
      %c0_123 = arith.constant 0 : index
      %c0_124 = arith.constant 0 : index
      %340 = vector.load %arg11[%c0_123, %c0_124] : memref<32x32xbf16, #tpu.memory_space<vmem>>, vector<32x32xbf16>
      %cst_125 = arith.constant dense<0.000000e+00> : vector<8x32xf32>
      %341 = tpu.matmul %335, %340, %cst_125 {dimension_numbers = #tpu.dot_dimension_numbers<[1], [0], [0], [1], [0, 0, 1, 1], [], []>} : vector<8x32xbf16>, vector<32x32xbf16>, vector<8x32xf32> -> vector<8x32xf32>
      %342 = arith.truncf %341 : vector<8x32xf32> to vector<8x32xbf16>
      %c0_126 = arith.constant 0 : index
      %c0_127 = arith.constant 0 : index
      %343 = vector.load %arg20[%c0_126, %c0_127] : memref<8x32xbf16, #tpu.memory_space<vmem>>, vector<8x32xbf16>
      tpu.vector_store %arg20[%c0_126, %c0_127], %342 {strides = array<i32>} : memref<8x32xbf16, #tpu.memory_space<vmem>>, vector<8x32xbf16>,
      %c0_128 = arith.constant 0 : index
      %c0_129 = arith.constant 0 : index
      %344 = vector.load %arg9[%c0_128, %c0_129] : memref<32x32xbf16, #tpu.memory_space<vmem>>, vector<32x32xbf16>
      %cst_130 = arith.constant dense<0.000000e+00> : vector<8x32xf32>
      %345 = tpu.matmul %325, %344, %cst_130 {dimension_numbers = #tpu.dot_dimension_numbers<[1], [0], [0], [1], [0, 0, 1, 1], [], []>} : vector<8x32xbf16>, vector<32x32xbf16>, vector<8x32xf32> -> vector<8x32xf32>
      %346 = arith.truncf %345 : vector<8x32xf32> to vector<8x32xbf16>
      %c0_131 = arith.constant 0 : index
      %c0_132 = arith.constant 0 : index
      %347 = vector.load %arg21[%c0_131, %c0_132] : memref<8x32xbf16, #tpu.memory_space<vmem>>, vector<8x32xbf16>
      tpu.vector_store %arg21[%c0_131, %c0_132], %346 {strides = array<i32>} : memref<8x32xbf16, #tpu.memory_space<vmem>>, vector<8x32xbf16>,
      %c0_133 = arith.constant 0 : index
      %c0_134 = arith.constant 0 : index
      %348 = vector.load %arg12[%c0_133, %c0_134] : memref<32x32xbf16, #tpu.memory_space<vmem>>, vector<32x32xbf16>
      %cst_135 = arith.constant dense<0.000000e+00> : vector<8x32xf32>
      %349 = tpu.matmul %335, %348, %cst_135 {dimension_numbers = #tpu.dot_dimension_numbers<[1], [0], [0], [1], [0, 0, 1, 1], [], []>} : vector<8x32xbf16>, vector<32x32xbf16>, vector<8x32xf32> -> vector<8x32xf32>
      %350 = arith.truncf %349 : vector<8x32xf32> to vector<8x32xbf16>
      %c0_136 = arith.constant 0 : index
      %c0_137 = arith.constant 0 : index
      %351 = vector.load %arg22[%c0_136, %c0_137] : memref<8x32xbf16, #tpu.memory_space<vmem>>, vector<8x32xbf16>
      tpu.vector_store %arg22[%c0_136, %c0_137], %350 {strides = array<i32>} : memref<8x32xbf16, #tpu.memory_space<vmem>>, vector<8x32xbf16>,
      %c0_138 = arith.constant 0 : index
      %c0_139 = arith.constant 0 : index
      %352 = vector.load %arg10[%c0_138, %c0_139] : memref<32x32xbf16, #tpu.memory_space<vmem>>, vector<32x32xbf16>
      %cst_140 = arith.constant dense<0.000000e+00> : vector<8x32xf32>
      %353 = tpu.matmul %325, %352, %cst_140 {dimension_numbers = #tpu.dot_dimension_numbers<[1], [0], [0], [1], [0, 0, 1, 1], [], []>} : vector<8x32xbf16>, vector<32x32xbf16>, vector<8x32xf32> -> vector<8x32xf32>
      %c0_141 = arith.constant 0 : index
      %c0_142 = arith.constant 0 : index
      %354 = vector.load %arg13[%c0_141, %c0_142] : memref<32x32xbf16, #tpu.memory_space<vmem>>, vector<32x32xbf16>
      %cst_143 = arith.constant dense<0.000000e+00> : vector<8x32xf32>
      %355 = tpu.matmul %335, %354, %cst_143 {dimension_numbers = #tpu.dot_dimension_numbers<[1], [0], [0], [1], [0, 0, 1, 1], [], []>} : vector<8x32xbf16>, vector<32x32xbf16>, vector<8x32xf32> -> vector<8x32xf32>
      %356 = arith.addf %353, %355 : vector<8x32xf32>
      %cst_144 = arith.constant 5.000000e-01 : f32
      %357 = vector.broadcast %cst_144 : f32 to vector<8x32xf32>
      %358 = arith.mulf %357, %356 : vector<8x32xf32>
      %359 = arith.truncf %358 : vector<8x32xf32> to vector<8x32xbf16>
      %c0_145 = arith.constant 0 : index
      %c0_146 = arith.constant 0 : index
      %360 = vector.load %arg23[%c0_145, %c0_146] : memref<8x32xbf16, #tpu.memory_space<vmem>>, vector<8x32xbf16>
      tpu.vector_store %arg23[%c0_145, %c0_146], %359 {strides = array<i32>} : memref<8x32xbf16, #tpu.memory_space<vmem>>, vector<8x32xbf16>,
    } else {
    }
    %c0 = arith.constant 0 : index
    %c0_1 = arith.constant 0 : index
    %3 = vector.load %arg19[%c0, %c0_1] : memref<8x32xbf16, #tpu.memory_space<vmem>>, vector<8x32xbf16>
    %c0_2 = arith.constant 0 : index
    %c0_3 = arith.constant 0 : index
    %4 = vector.load %arg20[%c0_2, %c0_3] : memref<8x32xbf16, #tpu.memory_space<vmem>>, vector<8x32xbf16>
    %c0_4 = arith.constant 0 : index
    %c0_5 = arith.constant 0 : index
    %5 = vector.load %arg21[%c0_4, %c0_5] : memref<8x32xbf16, #tpu.memory_space<vmem>>, vector<8x32xbf16>
    %c0_6 = arith.constant 0 : index
    %c0_7 = arith.constant 0 : index
    %6 = vector.load %arg22[%c0_6, %c0_7] : memref<8x32xbf16, #tpu.memory_space<vmem>>, vector<8x32xbf16>
    %c0_8 = arith.constant 0 : index
    %c0_9 = arith.constant 0 : index
    %7 = vector.load %arg23[%c0_8, %c0_9] : memref<8x32xbf16, #tpu.memory_space<vmem>>, vector<8x32xbf16>
    %8 = vector.extract_strided_slice %3 {offsets = [0, 0], sizes = [8, 4], strides = [1, 1]} : vector<8x32xbf16> to vector<8x4xbf16>
    %9 = vector.extract_strided_slice %5 {offsets = [0, 0], sizes = [8, 4], strides = [1, 1]} : vector<8x32xbf16> to vector<8x4xbf16>
    %cst = arith.constant dense<0.000000e+00> : vector<8x8xf32>
    %10 = tpu.matmul %8, %9, %cst {dimension_numbers = #tpu.dot_dimension_numbers<[1], [1], [0], [0], [0, 0, 1, 0], [], []>} : vector<8x4xbf16>, vector<8x4xbf16>, vector<8x8xf32> -> vector<8x8xf32>
    %11 = vector.extract_strided_slice %4 {offsets = [0, 0], sizes = [8, 4], strides = [1, 1]} : vector<8x32xbf16> to vector<8x4xbf16>
    %12 = vector.extract_strided_slice %6 {offsets = [0, 0], sizes = [8, 4], strides = [1, 1]} : vector<8x32xbf16> to vector<8x4xbf16>
    %cst_10 = arith.constant dense<0.000000e+00> : vector<8x8xf32>
    %13 = tpu.matmul %11, %12, %cst_10 {dimension_numbers = #tpu.dot_dimension_numbers<[1], [1], [0], [0], [0, 0, 1, 0], [], []>} : vector<8x4xbf16>, vector<8x4xbf16>, vector<8x8xf32> -> vector<8x8xf32>
    %cst_11 = arith.constant dense<0xFF800000> : vector<8xf32>
    %14 = vector.multi_reduction <maximumf>, %10, %cst_11 [1] : vector<8x8xf32> to vector<8xf32>
    %15 = vector.shape_cast %14 : vector<8xf32> to vector<8x1xf32>
    %16 = vector.broadcast %15 : vector<8x1xf32> to vector<8x8xf32>
    %17 = arith.subf %10, %16 : vector<8x8xf32>
    %18 = math.exp %17 : vector<8x8xf32>
    %cst_12 = arith.constant dense<0.000000e+00> : vector<8xf32>
    %19 = vector.multi_reduction <add>, %18, %cst_12 [1] : vector<8x8xf32> to vector<8xf32>
    %20 = vector.shape_cast %19 : vector<8xf32> to vector<8x1xf32>
    %cst_13 = arith.constant 1.000000e+00 : f32
    %21 = vector.broadcast %cst_13 : f32 to vector<8x1xf32>
    %22 = arith.divf %21, %20 : vector<8x1xf32>
    %23 = vector.broadcast %22 : vector<8x1xf32> to vector<8x8xf32>
    %24 = arith.mulf %18, %23 : vector<8x8xf32>
    %cst_14 = arith.constant dense<0xFF800000> : vector<8xf32>
    %25 = vector.multi_reduction <maximumf>, %13, %cst_14 [1] : vector<8x8xf32> to vector<8xf32>
    %26 = vector.shape_cast %25 : vector<8xf32> to vector<8x1xf32>
    %27 = vector.broadcast %26 : vector<8x1xf32> to vector<8x8xf32>
    %28 = arith.subf %13, %27 : vector<8x8xf32>
    %29 = math.exp %28 : vector<8x8xf32>
    %cst_15 = arith.constant dense<0.000000e+00> : vector<8xf32>
    %30 = vector.multi_reduction <add>, %29, %cst_15 [1] : vector<8x8xf32> to vector<8xf32>
    %31 = vector.shape_cast %30 : vector<8xf32> to vector<8x1xf32>
    %cst_16 = arith.constant 1.000000e+00 : f32
    %32 = vector.broadcast %cst_16 : f32 to vector<8x1xf32>
    %33 = arith.divf %32, %31 : vector<8x1xf32>
    %34 = vector.broadcast %33 : vector<8x1xf32> to vector<8x8xf32>
    %35 = arith.mulf %29, %34 : vector<8x8xf32>
    %36 = arith.subf %24, %35 : vector<8x8xf32>
    %37 = arith.truncf %36 : vector<8x8xf32> to vector<8x8xbf16>
    %38 = vector.extract_strided_slice %7 {offsets = [0, 0], sizes = [8, 4], strides = [1, 1]} : vector<8x32xbf16> to vector<8x4xbf16>
    %cst_17 = arith.constant dense<0.000000e+00> : vector<8x4xf32>
    %39 = tpu.matmul %37, %38, %cst_17 {dimension_numbers = #tpu.dot_dimension_numbers<[1], [0], [0], [1], [0, 0, 1, 1], [], []>} : vector<8x8xbf16>, vector<8x4xbf16>, vector<8x4xf32> -> vector<8x4xf32>
    %40 = vector.extract_strided_slice %3 {offsets = [0, 4], sizes = [8, 4], strides = [1, 1]} : vector<8x32xbf16> to vector<8x4xbf16>
    %41 = vector.extract_strided_slice %5 {offsets = [0, 4], sizes = [8, 4], strides = [1, 1]} : vector<8x32xbf16> to vector<8x4xbf16>
    %cst_18 = arith.constant dense<0.000000e+00> : vector<8x8xf32>
    %42 = tpu.matmul %40, %41, %cst_18 {dimension_numbers = #tpu.dot_dimension_numbers<[1], [1], [0], [0], [0, 0, 1, 0], [], []>} : vector<8x4xbf16>, vector<8x4xbf16>, vector<8x8xf32> -> vector<8x8xf32>
    %43 = vector.extract_strided_slice %4 {offsets = [0, 4], sizes = [8, 4], strides = [1, 1]} : vector<8x32xbf16> to vector<8x4xbf16>
    %44 = vector.extract_strided_slice %6 {offsets = [0, 4], sizes = [8, 4], strides = [1, 1]} : vector<8x32xbf16> to vector<8x4xbf16>
    %cst_19 = arith.constant dense<0.000000e+00> : vector<8x8xf32>
    %45 = tpu.matmul %43, %44, %cst_19 {dimension_numbers = #tpu.dot_dimension_numbers<[1], [1], [0], [0], [0, 0, 1, 0], [], []>} : vector<8x4xbf16>, vector<8x4xbf16>, vector<8x8xf32> -> vector<8x8xf32>
    %cst_20 = arith.constant dense<0xFF800000> : vector<8xf32>
    %46 = vector.multi_reduction <maximumf>, %42, %cst_20 [1] : vector<8x8xf32> to vector<8xf32>
    %47 = vector.shape_cast %46 : vector<8xf32> to vector<8x1xf32>
    %48 = vector.broadcast %47 : vector<8x1xf32> to vector<8x8xf32>
    %49 = arith.subf %42, %48 : vector<8x8xf32>
    %50 = math.exp %49 : vector<8x8xf32>
    %cst_21 = arith.constant dense<0.000000e+00> : vector<8xf32>
    %51 = vector.multi_reduction <add>, %50, %cst_21 [1] : vector<8x8xf32> to vector<8xf32>
    %52 = vector.shape_cast %51 : vector<8xf32> to vector<8x1xf32>
    %cst_22 = arith.constant 1.000000e+00 : f32
    %53 = vector.broadcast %cst_22 : f32 to vector<8x1xf32>
    %54 = arith.divf %53, %52 : vector<8x1xf32>
    %55 = vector.broadcast %54 : vector<8x1xf32> to vector<8x8xf32>
    %56 = arith.mulf %50, %55 : vector<8x8xf32>
    %cst_23 = arith.constant dense<0xFF800000> : vector<8xf32>
    %57 = vector.multi_reduction <maximumf>, %45, %cst_23 [1] : vector<8x8xf32> to vector<8xf32>
    %58 = vector.shape_cast %57 : vector<8xf32> to vector<8x1xf32>
    %59 = vector.broadcast %58 : vector<8x1xf32> to vector<8x8xf32>
    %60 = arith.subf %45, %59 : vector<8x8xf32>
    %61 = math.exp %60 : vector<8x8xf32>
    %cst_24 = arith.constant dense<0.000000e+00> : vector<8xf32>
    %62 = vector.multi_reduction <add>, %61, %cst_24 [1] : vector<8x8xf32> to vector<8xf32>
    %63 = vector.shape_cast %62 : vector<8xf32> to vector<8x1xf32>
    %cst_25 = arith.constant 1.000000e+00 : f32
    %64 = vector.broadcast %cst_25 : f32 to vector<8x1xf32>
    %65 = arith.divf %64, %63 : vector<8x1xf32>
    %66 = vector.broadcast %65 : vector<8x1xf32> to vector<8x8xf32>
    %67 = arith.mulf %61, %66 : vector<8x8xf32>
    %68 = arith.subf %56, %67 : vector<8x8xf32>
    %69 = arith.truncf %68 : vector<8x8xf32> to vector<8x8xbf16>
    %70 = vector.extract_strided_slice %7 {offsets = [0, 4], sizes = [8, 4], strides = [1, 1]} : vector<8x32xbf16> to vector<8x4xbf16>
    %cst_26 = arith.constant dense<0.000000e+00> : vector<8x4xf32>
    %71 = tpu.matmul %69, %70, %cst_26 {dimension_numbers = #tpu.dot_dimension_numbers<[1], [0], [0], [1], [0, 0, 1, 1], [], []>} : vector<8x8xbf16>, vector<8x4xbf16>, vector<8x4xf32> -> vector<8x4xf32>
    %72 = vector.extract_strided_slice %3 {offsets = [0, 8], sizes = [8, 4], strides = [1, 1]} : vector<8x32xbf16> to vector<8x4xbf16>
    %73 = vector.extract_strided_slice %5 {offsets = [0, 8], sizes = [8, 4], strides = [1, 1]} : vector<8x32xbf16> to vector<8x4xbf16>
    %cst_27 = arith.constant dense<0.000000e+00> : vector<8x8xf32>
    %74 = tpu.matmul %72, %73, %cst_27 {dimension_numbers = #tpu.dot_dimension_numbers<[1], [1], [0], [0], [0, 0, 1, 0], [], []>} : vector<8x4xbf16>, vector<8x4xbf16>, vector<8x8xf32> -> vector<8x8xf32>
    %75 = vector.extract_strided_slice %4 {offsets = [0, 8], sizes = [8, 4], strides = [1, 1]} : vector<8x32xbf16> to vector<8x4xbf16>
    %76 = vector.extract_strided_slice %6 {offsets = [0, 8], sizes = [8, 4], strides = [1, 1]} : vector<8x32xbf16> to vector<8x4xbf16>
    %cst_28 = arith.constant dense<0.000000e+00> : vector<8x8xf32>
    %77 = tpu.matmul %75, %76, %cst_28 {dimension_numbers = #tpu.dot_dimension_numbers<[1], [1], [0], [0], [0, 0, 1, 0], [], []>} : vector<8x4xbf16>, vector<8x4xbf16>, vector<8x8xf32> -> vector<8x8xf32>
    %cst_29 = arith.constant dense<0xFF800000> : vector<8xf32>
    %78 = vector.multi_reduction <maximumf>, %74, %cst_29 [1] : vector<8x8xf32> to vector<8xf32>
    %79 = vector.shape_cast %78 : vector<8xf32> to vector<8x1xf32>
    %80 = vector.broadcast %79 : vector<8x1xf32> to vector<8x8xf32>
    %81 = arith.subf %74, %80 : vector<8x8xf32>
    %82 = math.exp %81 : vector<8x8xf32>
    %cst_30 = arith.constant dense<0.000000e+00> : vector<8xf32>
    %83 = vector.multi_reduction <add>, %82, %cst_30 [1] : vector<8x8xf32> to vector<8xf32>
    %84 = vector.shape_cast %83 : vector<8xf32> to vector<8x1xf32>
    %cst_31 = arith.constant 1.000000e+00 : f32
    %85 = vector.broadcast %cst_31 : f32 to vector<8x1xf32>
    %86 = arith.divf %85, %84 : vector<8x1xf32>
    %87 = vector.broadcast %86 : vector<8x1xf32> to vector<8x8xf32>
    %88 = arith.mulf %82, %87 : vector<8x8xf32>
    %cst_32 = arith.constant dense<0xFF800000> : vector<8xf32>
    %89 = vector.multi_reduction <maximumf>, %77, %cst_32 [1] : vector<8x8xf32> to vector<8xf32>
    %90 = vector.shape_cast %89 : vector<8xf32> to vector<8x1xf32>
    %91 = vector.broadcast %90 : vector<8x1xf32> to vector<8x8xf32>
    %92 = arith.subf %77, %91 : vector<8x8xf32>
    %93 = math.exp %92 : vector<8x8xf32>
    %cst_33 = arith.constant dense<0.000000e+00> : vector<8xf32>
    %94 = vector.multi_reduction <add>, %93, %cst_33 [1] : vector<8x8xf32> to vector<8xf32>
    %95 = vector.shape_cast %94 : vector<8xf32> to vector<8x1xf32>
    %cst_34 = arith.constant 1.000000e+00 : f32
    %96 = vector.broadcast %cst_34 : f32 to vector<8x1xf32>
    %97 = arith.divf %96, %95 : vector<8x1xf32>
    %98 = vector.broadcast %97 : vector<8x1xf32> to vector<8x8xf32>
    %99 = arith.mulf %93, %98 : vector<8x8xf32>
    %100 = arith.subf %88, %99 : vector<8x8xf32>
    %101 = arith.truncf %100 : vector<8x8xf32> to vector<8x8xbf16>
    %102 = vector.extract_strided_slice %7 {offsets = [0, 8], sizes = [8, 4], strides = [1, 1]} : vector<8x32xbf16> to vector<8x4xbf16>
    %cst_35 = arith.constant dense<0.000000e+00> : vector<8x4xf32>
    %103 = tpu.matmul %101, %102, %cst_35 {dimension_numbers = #tpu.dot_dimension_numbers<[1], [0], [0], [1], [0, 0, 1, 1], [], []>} : vector<8x8xbf16>, vector<8x4xbf16>, vector<8x4xf32> -> vector<8x4xf32>
    %104 = vector.extract_strided_slice %3 {offsets = [0, 12], sizes = [8, 4], strides = [1, 1]} : vector<8x32xbf16> to vector<8x4xbf16>
    %105 = vector.extract_strided_slice %5 {offsets = [0, 12], sizes = [8, 4], strides = [1, 1]} : vector<8x32xbf16> to vector<8x4xbf16>
    %cst_36 = arith.constant dense<0.000000e+00> : vector<8x8xf32>
    %106 = tpu.matmul %104, %105, %cst_36 {dimension_numbers = #tpu.dot_dimension_numbers<[1], [1], [0], [0], [0, 0, 1, 0], [], []>} : vector<8x4xbf16>, vector<8x4xbf16>, vector<8x8xf32> -> vector<8x8xf32>
    %107 = vector.extract_strided_slice %4 {offsets = [0, 12], sizes = [8, 4], strides = [1, 1]} : vector<8x32xbf16> to vector<8x4xbf16>
    %108 = vector.extract_strided_slice %6 {offsets = [0, 12], sizes = [8, 4], strides = [1, 1]} : vector<8x32xbf16> to vector<8x4xbf16>
    %cst_37 = arith.constant dense<0.000000e+00> : vector<8x8xf32>
    %109 = tpu.matmul %107, %108, %cst_37 {dimension_numbers = #tpu.dot_dimension_numbers<[1], [1], [0], [0], [0, 0, 1, 0], [], []>} : vector<8x4xbf16>, vector<8x4xbf16>, vector<8x8xf32> -> vector<8x8xf32>
    %cst_38 = arith.constant dense<0xFF800000> : vector<8xf32>
    %110 = vector.multi_reduction <maximumf>, %106, %cst_38 [1] : vector<8x8xf32> to vector<8xf32>
    %111 = vector.shape_cast %110 : vector<8xf32> to vector<8x1xf32>
    %112 = vector.broadcast %111 : vector<8x1xf32> to vector<8x8xf32>
    %113 = arith.subf %106, %112 : vector<8x8xf32>
    %114 = math.exp %113 : vector<8x8xf32>
    %cst_39 = arith.constant dense<0.000000e+00> : vector<8xf32>
    %115 = vector.multi_reduction <add>, %114, %cst_39 [1] : vector<8x8xf32> to vector<8xf32>
    %116 = vector.shape_cast %115 : vector<8xf32> to vector<8x1xf32>
    %cst_40 = arith.constant 1.000000e+00 : f32
    %117 = vector.broadcast %cst_40 : f32 to vector<8x1xf32>
    %118 = arith.divf %117, %116 : vector<8x1xf32>
    %119 = vector.broadcast %118 : vector<8x1xf32> to vector<8x8xf32>
    %120 = arith.mulf %114, %119 : vector<8x8xf32>
    %cst_41 = arith.constant dense<0xFF800000> : vector<8xf32>
    %121 = vector.multi_reduction <maximumf>, %109, %cst_41 [1] : vector<8x8xf32> to vector<8xf32>
    %122 = vector.shape_cast %121 : vector<8xf32> to vector<8x1xf32>
    %123 = vector.broadcast %122 : vector<8x1xf32> to vector<8x8xf32>
    %124 = arith.subf %109, %123 : vector<8x8xf32>
    %125 = math.exp %124 : vector<8x8xf32>
    %cst_42 = arith.constant dense<0.000000e+00> : vector<8xf32>
    %126 = vector.multi_reduction <add>, %125, %cst_42 [1] : vector<8x8xf32> to vector<8xf32>
    %127 = vector.shape_cast %126 : vector<8xf32> to vector<8x1xf32>
    %cst_43 = arith.constant 1.000000e+00 : f32
    %128 = vector.broadcast %cst_43 : f32 to vector<8x1xf32>
    %129 = arith.divf %128, %127 : vector<8x1xf32>
    %130 = vector.broadcast %129 : vector<8x1xf32> to vector<8x8xf32>
    %131 = arith.mulf %125, %130 : vector<8x8xf32>
    %132 = arith.subf %120, %131 : vector<8x8xf32>
    %133 = arith.truncf %132 : vector<8x8xf32> to vector<8x8xbf16>
    %134 = vector.extract_strided_slice %7 {offsets = [0, 12], sizes = [8, 4], strides = [1, 1]} : vector<8x32xbf16> to vector<8x4xbf16>
    %cst_44 = arith.constant dense<0.000000e+00> : vector<8x4xf32>
    %135 = tpu.matmul %133, %134, %cst_44 {dimension_numbers = #tpu.dot_dimension_numbers<[1], [0], [0], [1], [0, 0, 1, 1], [], []>} : vector<8x8xbf16>, vector<8x4xbf16>, vector<8x4xf32> -> vector<8x4xf32>
    %136 = vector.extract_strided_slice %3 {offsets = [0, 16], sizes = [8, 4], strides = [1, 1]} : vector<8x32xbf16> to vector<8x4xbf16>
    %137 = vector.extract_strided_slice %5 {offsets = [0, 16], sizes = [8, 4], strides = [1, 1]} : vector<8x32xbf16> to vector<8x4xbf16>
    %cst_45 = arith.constant dense<0.000000e+00> : vector<8x8xf32>
    %138 = tpu.matmul %136, %137, %cst_45 {dimension_numbers = #tpu.dot_dimension_numbers<[1], [1], [0], [0], [0, 0, 1, 0], [], []>} : vector<8x4xbf16>, vector<8x4xbf16>, vector<8x8xf32> -> vector<8x8xf32>
    %139 = vector.extract_strided_slice %4 {offsets = [0, 16], sizes = [8, 4], strides = [1, 1]} : vector<8x32xbf16> to vector<8x4xbf16>
    %140 = vector.extract_strided_slice %6 {offsets = [0, 16], sizes = [8, 4], strides = [1, 1]} : vector<8x32xbf16> to vector<8x4xbf16>
    %cst_46 = arith.constant dense<0.000000e+00> : vector<8x8xf32>
    %141 = tpu.matmul %139, %140, %cst_46 {dimension_numbers = #tpu.dot_dimension_numbers<[1], [1], [0], [0], [0, 0, 1, 0], [], []>} : vector<8x4xbf16>, vector<8x4xbf16>, vector<8x8xf32> -> vector<8x8xf32>
    %cst_47 = arith.constant dense<0xFF800000> : vector<8xf32>
    %142 = vector.multi_reduction <maximumf>, %138, %cst_47 [1] : vector<8x8xf32> to vector<8xf32>
    %143 = vector.shape_cast %142 : vector<8xf32> to vector<8x1xf32>
    %144 = vector.broadcast %143 : vector<8x1xf32> to vector<8x8xf32>
    %145 = arith.subf %138, %144 : vector<8x8xf32>
    %146 = math.exp %145 : vector<8x8xf32>
    %cst_48 = arith.constant dense<0.000000e+00> : vector<8xf32>
    %147 = vector.multi_reduction <add>, %146, %cst_48 [1] : vector<8x8xf32> to vector<8xf32>
    %148 = vector.shape_cast %147 : vector<8xf32> to vector<8x1xf32>
    %cst_49 = arith.constant 1.000000e+00 : f32
    %149 = vector.broadcast %cst_49 : f32 to vector<8x1xf32>
    %150 = arith.divf %149, %148 : vector<8x1xf32>
    %151 = vector.broadcast %150 : vector<8x1xf32> to vector<8x8xf32>
    %152 = arith.mulf %146, %151 : vector<8x8xf32>
    %cst_50 = arith.constant dense<0xFF800000> : vector<8xf32>
    %153 = vector.multi_reduction <maximumf>, %141, %cst_50 [1] : vector<8x8xf32> to vector<8xf32>
    %154 = vector.shape_cast %153 : vector<8xf32> to vector<8x1xf32>
    %155 = vector.broadcast %154 : vector<8x1xf32> to vector<8x8xf32>
    %156 = arith.subf %141, %155 : vector<8x8xf32>
    %157 = math.exp %156 : vector<8x8xf32>
    %cst_51 = arith.constant dense<0.000000e+00> : vector<8xf32>
    %158 = vector.multi_reduction <add>, %157, %cst_51 [1] : vector<8x8xf32> to vector<8xf32>
    %159 = vector.shape_cast %158 : vector<8xf32> to vector<8x1xf32>
    %cst_52 = arith.constant 1.000000e+00 : f32
    %160 = vector.broadcast %cst_52 : f32 to vector<8x1xf32>
    %161 = arith.divf %160, %159 : vector<8x1xf32>
    %162 = vector.broadcast %161 : vector<8x1xf32> to vector<8x8xf32>
    %163 = arith.mulf %157, %162 : vector<8x8xf32>
    %164 = arith.subf %152, %163 : vector<8x8xf32>
    %165 = arith.truncf %164 : vector<8x8xf32> to vector<8x8xbf16>
    %166 = vector.extract_strided_slice %7 {offsets = [0, 16], sizes = [8, 4], strides = [1, 1]} : vector<8x32xbf16> to vector<8x4xbf16>
    %cst_53 = arith.constant dense<0.000000e+00> : vector<8x4xf32>
    %167 = tpu.matmul %165, %166, %cst_53 {dimension_numbers = #tpu.dot_dimension_numbers<[1], [0], [0], [1], [0, 0, 1, 1], [], []>} : vector<8x8xbf16>, vector<8x4xbf16>, vector<8x4xf32> -> vector<8x4xf32>
    %168 = vector.extract_strided_slice %3 {offsets = [0, 20], sizes = [8, 4], strides = [1, 1]} : vector<8x32xbf16> to vector<8x4xbf16>
    %169 = vector.extract_strided_slice %5 {offsets = [0, 20], sizes = [8, 4], strides = [1, 1]} : vector<8x32xbf16> to vector<8x4xbf16>
    %cst_54 = arith.constant dense<0.000000e+00> : vector<8x8xf32>
    %170 = tpu.matmul %168, %169, %cst_54 {dimension_numbers = #tpu.dot_dimension_numbers<[1], [1], [0], [0], [0, 0, 1, 0], [], []>} : vector<8x4xbf16>, vector<8x4xbf16>, vector<8x8xf32> -> vector<8x8xf32>
    %171 = vector.extract_strided_slice %4 {offsets = [0, 20], sizes = [8, 4], strides = [1, 1]} : vector<8x32xbf16> to vector<8x4xbf16>
    %172 = vector.extract_strided_slice %6 {offsets = [0, 20], sizes = [8, 4], strides = [1, 1]} : vector<8x32xbf16> to vector<8x4xbf16>
    %cst_55 = arith.constant dense<0.000000e+00> : vector<8x8xf32>
    %173 = tpu.matmul %171, %172, %cst_55 {dimension_numbers = #tpu.dot_dimension_numbers<[1], [1], [0], [0], [0, 0, 1, 0], [], []>} : vector<8x4xbf16>, vector<8x4xbf16>, vector<8x8xf32> -> vector<8x8xf32>
    %cst_56 = arith.constant dense<0xFF800000> : vector<8xf32>
    %174 = vector.multi_reduction <maximumf>, %170, %cst_56 [1] : vector<8x8xf32> to vector<8xf32>
    %175 = vector.shape_cast %174 : vector<8xf32> to vector<8x1xf32>
    %176 = vector.broadcast %175 : vector<8x1xf32> to vector<8x8xf32>
    %177 = arith.subf %170, %176 : vector<8x8xf32>
    %178 = math.exp %177 : vector<8x8xf32>
    %cst_57 = arith.constant dense<0.000000e+00> : vector<8xf32>
    %179 = vector.multi_reduction <add>, %178, %cst_57 [1] : vector<8x8xf32> to vector<8xf32>
    %180 = vector.shape_cast %179 : vector<8xf32> to vector<8x1xf32>
    %cst_58 = arith.constant 1.000000e+00 : f32
    %181 = vector.broadcast %cst_58 : f32 to vector<8x1xf32>
    %182 = arith.divf %181, %180 : vector<8x1xf32>
    %183 = vector.broadcast %182 : vector<8x1xf32> to vector<8x8xf32>
    %184 = arith.mulf %178, %183 : vector<8x8xf32>
    %cst_59 = arith.constant dense<0xFF800000> : vector<8xf32>
    %185 = vector.multi_reduction <maximumf>, %173, %cst_59 [1] : vector<8x8xf32> to vector<8xf32>
    %186 = vector.shape_cast %185 : vector<8xf32> to vector<8x1xf32>
    %187 = vector.broadcast %186 : vector<8x1xf32> to vector<8x8xf32>
    %188 = arith.subf %173, %187 : vector<8x8xf32>
    %189 = math.exp %188 : vector<8x8xf32>
    %cst_60 = arith.constant dense<0.000000e+00> : vector<8xf32>
    %190 = vector.multi_reduction <add>, %189, %cst_60 [1] : vector<8x8xf32> to vector<8xf32>
    %191 = vector.shape_cast %190 : vector<8xf32> to vector<8x1xf32>
    %cst_61 = arith.constant 1.000000e+00 : f32
    %192 = vector.broadcast %cst_61 : f32 to vector<8x1xf32>
    %193 = arith.divf %192, %191 : vector<8x1xf32>
    %194 = vector.broadcast %193 : vector<8x1xf32> to vector<8x8xf32>
    %195 = arith.mulf %189, %194 : vector<8x8xf32>
    %196 = arith.subf %184, %195 : vector<8x8xf32>
    %197 = arith.truncf %196 : vector<8x8xf32> to vector<8x8xbf16>
    %198 = vector.extract_strided_slice %7 {offsets = [0, 20], sizes = [8, 4], strides = [1, 1]} : vector<8x32xbf16> to vector<8x4xbf16>
    %cst_62 = arith.constant dense<0.000000e+00> : vector<8x4xf32>
    %199 = tpu.matmul %197, %198, %cst_62 {dimension_numbers = #tpu.dot_dimension_numbers<[1], [0], [0], [1], [0, 0, 1, 1], [], []>} : vector<8x8xbf16>, vector<8x4xbf16>, vector<8x4xf32> -> vector<8x4xf32>
    %200 = vector.extract_strided_slice %3 {offsets = [0, 24], sizes = [8, 4], strides = [1, 1]} : vector<8x32xbf16> to vector<8x4xbf16>
    %201 = vector.extract_strided_slice %5 {offsets = [0, 24], sizes = [8, 4], strides = [1, 1]} : vector<8x32xbf16> to vector<8x4xbf16>
    %cst_63 = arith.constant dense<0.000000e+00> : vector<8x8xf32>
    %202 = tpu.matmul %200, %201, %cst_63 {dimension_numbers = #tpu.dot_dimension_numbers<[1], [1], [0], [0], [0, 0, 1, 0], [], []>} : vector<8x4xbf16>, vector<8x4xbf16>, vector<8x8xf32> -> vector<8x8xf32>
    %203 = vector.extract_strided_slice %4 {offsets = [0, 24], sizes = [8, 4], strides = [1, 1]} : vector<8x32xbf16> to vector<8x4xbf16>
    %204 = vector.extract_strided_slice %6 {offsets = [0, 24], sizes = [8, 4], strides = [1, 1]} : vector<8x32xbf16> to vector<8x4xbf16>
    %cst_64 = arith.constant dense<0.000000e+00> : vector<8x8xf32>
    %205 = tpu.matmul %203, %204, %cst_64 {dimension_numbers = #tpu.dot_dimension_numbers<[1], [1], [0], [0], [0, 0, 1, 0], [], []>} : vector<8x4xbf16>, vector<8x4xbf16>, vector<8x8xf32> -> vector<8x8xf32>
    %cst_65 = arith.constant dense<0xFF800000> : vector<8xf32>
    %206 = vector.multi_reduction <maximumf>, %202, %cst_65 [1] : vector<8x8xf32> to vector<8xf32>
    %207 = vector.shape_cast %206 : vector<8xf32> to vector<8x1xf32>
    %208 = vector.broadcast %207 : vector<8x1xf32> to vector<8x8xf32>
    %209 = arith.subf %202, %208 : vector<8x8xf32>
    %210 = math.exp %209 : vector<8x8xf32>
    %cst_66 = arith.constant dense<0.000000e+00> : vector<8xf32>
    %211 = vector.multi_reduction <add>, %210, %cst_66 [1] : vector<8x8xf32> to vector<8xf32>
    %212 = vector.shape_cast %211 : vector<8xf32> to vector<8x1xf32>
    %cst_67 = arith.constant 1.000000e+00 : f32
    %213 = vector.broadcast %cst_67 : f32 to vector<8x1xf32>
    %214 = arith.divf %213, %212 : vector<8x1xf32>
    %215 = vector.broadcast %214 : vector<8x1xf32> to vector<8x8xf32>
    %216 = arith.mulf %210, %215 : vector<8x8xf32>
    %cst_68 = arith.constant dense<0xFF800000> : vector<8xf32>
    %217 = vector.multi_reduction <maximumf>, %205, %cst_68 [1] : vector<8x8xf32> to vector<8xf32>
    %218 = vector.shape_cast %217 : vector<8xf32> to vector<8x1xf32>
    %219 = vector.broadcast %218 : vector<8x1xf32> to vector<8x8xf32>
    %220 = arith.subf %205, %219 : vector<8x8xf32>
    %221 = math.exp %220 : vector<8x8xf32>
    %cst_69 = arith.constant dense<0.000000e+00> : vector<8xf32>
    %222 = vector.multi_reduction <add>, %221, %cst_69 [1] : vector<8x8xf32> to vector<8xf32>
    %223 = vector.shape_cast %222 : vector<8xf32> to vector<8x1xf32>
    %cst_70 = arith.constant 1.000000e+00 : f32
    %224 = vector.broadcast %cst_70 : f32 to vector<8x1xf32>
    %225 = arith.divf %224, %223 : vector<8x1xf32>
    %226 = vector.broadcast %225 : vector<8x1xf32> to vector<8x8xf32>
    %227 = arith.mulf %221, %226 : vector<8x8xf32>
    %228 = arith.subf %216, %227 : vector<8x8xf32>
    %229 = arith.truncf %228 : vector<8x8xf32> to vector<8x8xbf16>
    %230 = vector.extract_strided_slice %7 {offsets = [0, 24], sizes = [8, 4], strides = [1, 1]} : vector<8x32xbf16> to vector<8x4xbf16>
    %cst_71 = arith.constant dense<0.000000e+00> : vector<8x4xf32>
    %231 = tpu.matmul %229, %230, %cst_71 {dimension_numbers = #tpu.dot_dimension_numbers<[1], [0], [0], [1], [0, 0, 1, 1], [], []>} : vector<8x8xbf16>, vector<8x4xbf16>, vector<8x4xf32> -> vector<8x4xf32>
    %232 = vector.extract_strided_slice %3 {offsets = [0, 28], sizes = [8, 4], strides = [1, 1]} : vector<8x32xbf16> to vector<8x4xbf16>
    %233 = vector.extract_strided_slice %5 {offsets = [0, 28], sizes = [8, 4], strides = [1, 1]} : vector<8x32xbf16> to vector<8x4xbf16>
    %cst_72 = arith.constant dense<0.000000e+00> : vector<8x8xf32>
    %234 = tpu.matmul %232, %233, %cst_72 {dimension_numbers = #tpu.dot_dimension_numbers<[1], [1], [0], [0], [0, 0, 1, 0], [], []>} : vector<8x4xbf16>, vector<8x4xbf16>, vector<8x8xf32> -> vector<8x8xf32>
    %235 = vector.extract_strided_slice %4 {offsets = [0, 28], sizes = [8, 4], strides = [1, 1]} : vector<8x32xbf16> to vector<8x4xbf16>
    %236 = vector.extract_strided_slice %6 {offsets = [0, 28], sizes = [8, 4], strides = [1, 1]} : vector<8x32xbf16> to vector<8x4xbf16>
    %cst_73 = arith.constant dense<0.000000e+00> : vector<8x8xf32>
    %237 = tpu.matmul %235, %236, %cst_73 {dimension_numbers = #tpu.dot_dimension_numbers<[1], [1], [0], [0], [0, 0, 1, 0], [], []>} : vector<8x4xbf16>, vector<8x4xbf16>, vector<8x8xf32> -> vector<8x8xf32>
    %cst_74 = arith.constant dense<0xFF800000> : vector<8xf32>
    %238 = vector.multi_reduction <maximumf>, %234, %cst_74 [1] : vector<8x8xf32> to vector<8xf32>
    %239 = vector.shape_cast %238 : vector<8xf32> to vector<8x1xf32>
    %240 = vector.broadcast %239 : vector<8x1xf32> to vector<8x8xf32>
    %241 = arith.subf %234, %240 : vector<8x8xf32>
    %242 = math.exp %241 : vector<8x8xf32>
    %cst_75 = arith.constant dense<0.000000e+00> : vector<8xf32>
    %243 = vector.multi_reduction <add>, %242, %cst_75 [1] : vector<8x8xf32> to vector<8xf32>
    %244 = vector.shape_cast %243 : vector<8xf32> to vector<8x1xf32>
    %cst_76 = arith.constant 1.000000e+00 : f32
    %245 = vector.broadcast %cst_76 : f32 to vector<8x1xf32>
    %246 = arith.divf %245, %244 : vector<8x1xf32>
    %247 = vector.broadcast %246 : vector<8x1xf32> to vector<8x8xf32>
    %248 = arith.mulf %242, %247 : vector<8x8xf32>
    %cst_77 = arith.constant dense<0xFF800000> : vector<8xf32>
    %249 = vector.multi_reduction <maximumf>, %237, %cst_77 [1] : vector<8x8xf32> to vector<8xf32>
    %250 = vector.shape_cast %249 : vector<8xf32> to vector<8x1xf32>
    %251 = vector.broadcast %250 : vector<8x1xf32> to vector<8x8xf32>
    %252 = arith.subf %237, %251 : vector<8x8xf32>
    %253 = math.exp %252 : vector<8x8xf32>
    %cst_78 = arith.constant dense<0.000000e+00> : vector<8xf32>
    %254 = vector.multi_reduction <add>, %253, %cst_78 [1] : vector<8x8xf32> to vector<8xf32>
    %255 = vector.shape_cast %254 : vector<8xf32> to vector<8x1xf32>
    %cst_79 = arith.constant 1.000000e+00 : f32
    %256 = vector.broadcast %cst_79 : f32 to vector<8x1xf32>
    %257 = arith.divf %256, %255 : vector<8x1xf32>
    %258 = vector.broadcast %257 : vector<8x1xf32> to vector<8x8xf32>
    %259 = arith.mulf %253, %258 : vector<8x8xf32>
    %260 = arith.subf %248, %259 : vector<8x8xf32>
    %261 = arith.truncf %260 : vector<8x8xf32> to vector<8x8xbf16>
    %262 = vector.extract_strided_slice %7 {offsets = [0, 28], sizes = [8, 4], strides = [1, 1]} : vector<8x32xbf16> to vector<8x4xbf16>
    %cst_80 = arith.constant dense<0.000000e+00> : vector<8x4xf32>
    %263 = tpu.matmul %261, %262, %cst_80 {dimension_numbers = #tpu.dot_dimension_numbers<[1], [0], [0], [1], [0, 0, 1, 1], [], []>} : vector<8x8xbf16>, vector<8x4xbf16>, vector<8x4xf32> -> vector<8x4xf32>
    %264 = tpu.concatenate %39, %71, %103, %135, %167, %199, %231, %263 in 1 : vector<8x4xf32>, vector<8x4xf32>, vector<8x4xf32>, vector<8x4xf32>, vector<8x4xf32>, vector<8x4xf32>, vector<8x4xf32>, vector<8x4xf32> -> vector<8x32xf32>
    %265 = arith.truncf %264 : vector<8x32xf32> to vector<8x32xbf16>
    %c0_81 = arith.constant 0 : index
    %c0_82 = arith.constant 0 : index
    %266 = vector.load %arg24[%c0_81, %c0_82] : memref<8x32xbf16, #tpu.memory_space<vmem>>, vector<8x32xbf16>
    tpu.vector_store %arg24[%c0_81, %c0_82], %265 {strides = array<i32>} : memref<8x32xbf16, #tpu.memory_space<vmem>>, vector<8x32xbf16>,
    %c0_83 = arith.constant 0 : index
    %c0_84 = arith.constant 0 : index
    %267 = vector.load %arg24[%c0_83, %c0_84] : memref<8x32xbf16, #tpu.memory_space<vmem>>, vector<8x32xbf16>
    %c0_85 = arith.constant 0 : index
    %c0_86 = arith.constant 0 : index
    %268 = vector.load %arg14[%c0_85, %c0_86] : memref<32x32xbf16, #tpu.memory_space<vmem>>, vector<32x32xbf16>
    %cst_87 = arith.constant dense<0.000000e+00> : vector<8x32xf32>
    %269 = tpu.matmul %267, %268, %cst_87 {dimension_numbers = #tpu.dot_dimension_numbers<[1], [0], [0], [1], [0, 0, 1, 1], [], []>} : vector<8x32xbf16>, vector<32x32xbf16>, vector<8x32xf32> -> vector<8x32xf32>
    %c0_88 = arith.constant 0 : index
    %c0_89 = arith.constant 0 : index
    %270 = vector.load %arg15[%c0_88, %c0_89] : memref<1x32xf32, #tpu.memory_space<vmem>>, vector<1x32xf32>
    %271 = vector.shape_cast %270 : vector<1x32xf32> to vector<32xf32>
    %272 = vector.shape_cast %271 : vector<32xf32> to vector<1x32xf32>
    %273 = vector.broadcast %272 : vector<1x32xf32> to vector<8x32xf32>
    %274 = arith.addf %269, %273 : vector<8x32xf32>
    %cst_90 = arith.constant dense<0.000000e+00> : vector<8xf32>
    %275 = vector.multi_reduction <add>, %274, %cst_90 [1] : vector<8x32xf32> to vector<8xf32>
    %276 = vector.shape_cast %275 : vector<8xf32> to vector<8x1xf32>
    %cst_91 = arith.constant 3.200000e+01 : f32
    %277 = vector.broadcast %cst_91 : f32 to vector<8x1xf32>
    %278 = arith.divf %276, %277 : vector<8x1xf32>
    %279 = vector.broadcast %278 : vector<8x1xf32> to vector<8x32xf32>
    %280 = arith.subf %274, %279 : vector<8x32xf32>
    %281 = arith.mulf %280, %280 : vector<8x32xf32>
    %cst_92 = arith.constant dense<0.000000e+00> : vector<8xf32>
    %282 = vector.multi_reduction <add>, %281, %cst_92 [1] : vector<8x32xf32> to vector<8xf32>
    %283 = vector.shape_cast %282 : vector<8xf32> to vector<8x1xf32>
    %cst_93 = arith.constant 3.200000e+01 : f32
    %284 = vector.broadcast %cst_93 : f32 to vector<8x1xf32>
    %285 = arith.divf %283, %284 : vector<8x1xf32>
    %cst_94 = arith.constant 9.99999974E-6 : f32
    %286 = vector.broadcast %cst_94 : f32 to vector<8x1xf32>
    %287 = arith.addf %285, %286 : vector<8x1xf32>
    %288 = math.sqrt %287 : vector<8x1xf32>
    %cst_95 = arith.constant 1.000000e+00 : f32
    %289 = vector.broadcast %cst_95 : f32 to vector<8x1xf32>
    %290 = arith.divf %289, %288 : vector<8x1xf32>
    %291 = vector.broadcast %278 : vector<8x1xf32> to vector<8x32xf32>
    %292 = arith.subf %274, %291 : vector<8x32xf32>
    %293 = vector.broadcast %290 : vector<8x1xf32> to vector<8x32xf32>
    %294 = arith.mulf %292, %293 : vector<8x32xf32>
    %c0_96 = arith.constant 0 : index
    %c0_97 = arith.constant 0 : index
    %295 = vector.load %arg16[%c0_96, %c0_97] : memref<1x32xf32, #tpu.memory_space<vmem>>, vector<1x32xf32>
    %296 = vector.shape_cast %295 : vector<1x32xf32> to vector<32xf32>
    %297 = vector.shape_cast %296 : vector<32xf32> to vector<1x32xf32>
    %298 = vector.broadcast %297 : vector<1x32xf32> to vector<8x32xf32>
    %299 = arith.mulf %294, %298 : vector<8x32xf32>
    %c0_98 = arith.constant 0 : index
    %c0_99 = arith.constant 0 : index
    %300 = vector.load %arg17[%c0_98, %c0_99] : memref<1x32xf32, #tpu.memory_space<vmem>>, vector<1x32xf32>
    %301 = vector.shape_cast %300 : vector<1x32xf32> to vector<32xf32>
    %302 = vector.shape_cast %301 : vector<32xf32> to vector<1x32xf32>
    %303 = vector.broadcast %302 : vector<1x32xf32> to vector<8x32xf32>
    %304 = arith.addf %299, %303 : vector<8x32xf32>
    %c0_100 = arith.constant 0 : index
    %c0_101 = arith.constant 0 : index
    %c0_102 = arith.constant 0 : index
    %305 = vector.load %arg18[%c0_100, %c0_101, %c0_102] : memref<1x8x32xf32, #tpu.memory_space<vmem>>, vector<1x8x32xf32>
    %306 = vector.shape_cast %305 : vector<1x8x32xf32> to vector<8x32xf32>
    %307 = vector.shape_cast %304 : vector<8x32xf32> to vector<1x8x32xf32>
    tpu.vector_store %arg18[%c0_100, %c0_101, %c0_102], %307 {strides = array<i32>} : memref<1x8x32xf32, #tpu.memory_space<vmem>>, vector<1x8x32xf32>,
    return
  }
  func.func @transform_0(%arg0: i32, %arg1: i32) -> (i32, i32, i32) {
    %c0_i32 = arith.constant 0 : i32
    %c0_i32_0 = arith.constant 0 : i32
    %c0_i32_1 = arith.constant 0 : i32
    return %arg0, %c0_i32, %c0_i32_0 : i32, i32, i32
  }
  func.func @transform_1(%arg0: i32, %arg1: i32) -> (i32, i32) {
    %c0_i32 = arith.constant 0 : i32
    %c0_i32_0 = arith.constant 0 : i32
    %c0_i32_1 = arith.constant 0 : i32
    return %c0_i32, %c0_i32_0 : i32, i32
  }
  func.func @transform_2(%arg0: i32, %arg1: i32) -> (i32, i32) {
    %c0_i32 = arith.constant 0 : i32
    %c0_i32_0 = arith.constant 0 : i32
    %c0_i32_1 = arith.constant 0 : i32
    return %c0_i32, %c0_i32_0 : i32, i32
  }
  func.func @transform_3(%arg0: i32, %arg1: i32) -> (i32, i32) {
    %c0_i32 = arith.constant 0 : i32
    %c0_i32_0 = arith.constant 0 : i32
    %c0_i32_1 = arith.constant 0 : i32
    return %c0_i32, %c0_i32_0 : i32, i32
  }
  func.func @transform_4(%arg0: i32, %arg1: i32) -> (i32, i32) {
    %c0_i32 = arith.constant 0 : i32
    %c0_i32_0 = arith.constant 0 : i32
    %c0_i32_1 = arith.constant 0 : i32
    return %c0_i32, %c0_i32_0 : i32, i32
  }
  func.func @transform_5(%arg0: i32, %arg1: i32) -> (i32, i32) {
    %c0_i32 = arith.constant 0 : i32
    %c0_i32_0 = arith.constant 0 : i32
    %c0_i32_1 = arith.constant 0 : i32
    return %c0_i32, %c0_i32_0 : i32, i32
  }
  func.func @transform_6(%arg0: i32, %arg1: i32) -> (i32, i32) {
    %c0_i32 = arith.constant 0 : i32
    %c0_i32_0 = arith.constant 0 : i32
    %c0_i32_1 = arith.constant 0 : i32
    return %c0_i32, %c0_i32_0 : i32, i32
  }
  func.func @transform_7(%arg0: i32, %arg1: i32) -> (i32, i32) {
    %c0_i32 = arith.constant 0 : i32
    %c0_i32_0 = arith.constant 0 : i32
    %c0_i32_1 = arith.constant 0 : i32
    return %c0_i32, %c0_i32_0 : i32, i32
  }
  func.func @transform_8(%arg0: i32, %arg1: i32) -> (i32, i32) {
    %c0_i32 = arith.constant 0 : i32
    %c0_i32_0 = arith.constant 0 : i32
    %c0_i32_1 = arith.constant 0 : i32
    return %c0_i32, %c0_i32_0 : i32, i32
  }
  func.func @transform_9(%arg0: i32, %arg1: i32) -> (i32, i32) {
    %c0_i32 = arith.constant 0 : i32
    %c0_i32_0 = arith.constant 0 : i32
    %c0_i32_1 = arith.constant 0 : i32
    return %c0_i32, %c0_i32_0 : i32, i32
  }
  func.func @transform_10(%arg0: i32, %arg1: i32) -> (i32, i32) {
    %c0_i32 = arith.constant 0 : i32
    %c0_i32_0 = arith.constant 0 : i32
    %c0_i32_1 = arith.constant 0 : i32
    return %c0_i32, %c0_i32_0 : i32, i32
  }
  func.func @transform_11(%arg0: i32, %arg1: i32) -> (i32, i32) {
    %c0_i32 = arith.constant 0 : i32
    %c0_i32_0 = arith.constant 0 : i32
    %c0_i32_1 = arith.constant 0 : i32
    return %c0_i32, %c0_i32_0 : i32, i32
  }
  func.func @transform_12(%arg0: i32, %arg1: i32) -> (i32, i32) {
    %c0_i32 = arith.constant 0 : i32
    %c0_i32_0 = arith.constant 0 : i32
    %c0_i32_1 = arith.constant 0 : i32
    return %c0_i32, %c0_i32_0 : i32, i32
  }
  func.func @transform_13(%arg0: i32, %arg1: i32) -> (i32, i32) {
    %c0_i32 = arith.constant 0 : i32
    %c0_i32_0 = arith.constant 0 : i32
    %c0_i32_1 = arith.constant 0 : i32
    return %c0_i32, %c0_i32_0 : i32, i32
  }
  func.func @transform_14(%arg0: i32, %arg1: i32) -> (i32, i32) {
    %c0_i32 = arith.constant 0 : i32
    %c0_i32_0 = arith.constant 0 : i32
    %c0_i32_1 = arith.constant 0 : i32
    return %c0_i32, %c0_i32_0 : i32, i32
  }
  func.func @transform_15(%arg0: i32, %arg1: i32) -> (i32, i32) {
    %c0_i32 = arith.constant 0 : i32
    %c0_i32_0 = arith.constant 0 : i32
    %c0_i32_1 = arith.constant 0 : i32
    return %c0_i32, %c0_i32_0 : i32, i32
  }
  func.func @transform_16(%arg0: i32, %arg1: i32) -> (i32, i32, i32) {
    %c0_i32 = arith.constant 0 : i32
    %c0_i32_0 = arith.constant 0 : i32
    return %arg0, %arg1, %c0_i32 : i32, i32, i32
  }
}

</mosaic_0001>

<bundles_post_ra>
// kernel: tpu_custom_call.1
= control target key start
LH: loop header
LB: loop body
LE: loop exit
PB: predicated region body
PF: predicated region fallthrough
CT: control target
= control target key end

     0   :  { %s4773_s0 = inlined_call_operand.hbm [shape: bf16[2,8,32], index: 0, kind: input, shape index: {}]   ;;  %s4774_s1 = inlined_call_operand.hbm [shape: f32[1,32], index: 1, kind: input, shape index: {}]   ;;  %s4775_s2 = inlined_call_operand.hbm [shape: bf16[16,32], index: 2, kind: input, shape index: {}]   ;;  %s4776_s3 = inlined_call_operand.hbm [shape: f32[1,32], index: 3, kind: input, shape index: {}]   ;;  %s4777_s4 = inlined_call_operand.hbm [shape: bf16[16,32], index: 4, kind: input, shape index: {}]   ;;  %s4778_s5 = inlined_call_operand.hbm [shape: f32[1,32], index: 5, kind: input, shape index: {}]   ;;  %s4779_s6 = inlined_call_operand.hbm [shape: bf16[32,32], index: 6, kind: input, shape index: {}]   ;;  %s4780_s7 = inlined_call_operand.hbm [shape: bf16[32,32], index: 7, kind: input, shape index: {}]   ;;  %s4781_s8 = inlined_call_operand.hbm [shape: bf16[32,32], index: 8, kind: input, shape index: {}]   ;;  %s4782_s9 = inlined_call_operand.vmem [shape: bf16[32,32], index: 9, kind: input, shape index: {}]   ;;  %s4783_s10 = inlined_call_operand.hbm [shape: bf16[32,32], index: 10, kind: input, shape index: {}]   ;;  %s4784_s11 = inlined_call_operand.hbm [shape: bf16[32,32], index: 11, kind: input, shape index: {}]   ;;  %s4785_s12 = inlined_call_operand.hbm [shape: bf16[32,32], index: 12, kind: input, shape index: {}]   ;;  %s4786_s13 = inlined_call_operand.vmem [shape: f32[1,32], index: 13, kind: input, shape index: {}]   ;;  %s4787_s14 = inlined_call_operand.vmem [shape: f32[1,32], index: 14, kind: input, shape index: {}]   ;;  %s4788_s15 = inlined_call_operand.vmem [shape: f32[1,32], index: 15, kind: input, shape index: {}]   ;;  %s4789_s16 = inlined_call_operand.hbm [shape: f32[2,8,32], index: 16, kind: output, shape index: {}]  }
   0x1   :  { %4795 = sst [smem:[#allocation38_spill]] %s4773_s0 }
   0x2   :  { %4796 = sst [smem:[#allocation39_spill]] %s4774_s1 }
   0x3   :  { %4797 = sst [smem:[#allocation40_spill]] %s4775_s2 }
   0x4   :  { %4798 = sst [smem:[#allocation41_spill]] %s4776_s3 }
   0x5   :  { %4799 = sst [smem:[#allocation42_spill]] %s4777_s4 }
   0x6   :  { %4800 = sst [smem:[#allocation43_spill]] %s4778_s5 }
   0x7   :  { %4801 = sst [smem:[#allocation44_spill]] %s4779_s6 }
   0x8   :  { %4802 = sst [smem:[#allocation45_spill]] %s4780_s7 }
   0x9   :  { %4803 = sst [smem:[#allocation46_spill]] %s4781_s8 }
   0xa   :  { %4804 = sst [smem:[#allocation47_spill]] %s4783_s10 }
   0xb   :  { %4805 = sst [smem:[#allocation48_spill]] %s4787_s14 }
   0xc   :  { %4806 = sst [smem:[#allocation49_spill]] %s4788_s15 }
   0xd   :  { %4807 = sst [smem:[#allocation50_spill]] %s4789_s16 }
   0xe   :  { %21 = vsyncpa [#allocation9], 0 }
   0xf   :  { %23 = vsyncpa [#allocation9 + $0x1], 0 }
  0x10   :  { %24 = vsyncpa [#allocation12], 0 }
  0x11   :  { %25 = vsyncpa [#allocation15], 0 }
  0x12   :  { %26 = vsyncpa [#allocation18], 0 }
  0x13   :  { %27 = vsyncpa [#allocation21], 0 }
  0x14   :  { %28 = vsyncpa [#allocation24], 0 }
  0x15   :  { %29 = vsyncpa [#allocation27], 0 }
  0x16   :  { %30 = vsyncpa [#allocation10], 0 }
  0x17   :  { %32 = vsyncpa [#allocation10 + $0x1], 0  ;;  %s4148_s21 = smov 0   ;;  %s4150_s22 = smov 0  }
  0x18   :  { %s4152_s23 = smov 0   ;;  %s4154_s24 = smov 0  }
  0x19   :  { %s4156_s25 = smov 0   ;;  %s4158_s26 = smov 0  }
  0x1a LB: > { %4808 = sst [smem:[#allocation37_spill]] %s4022_s24  ;;  %s4790_s27 = sadd.s32 4294967295, %s4030_s26   ;;  %s4030_s26 = sphi %s4158_s26, %s38_s26   ;;  %s4026_s25 = sphi %s4156_s25, %s4841_s25   ;;  %s4022_s24 = sphi %s4154_s24, %s4840_s24   ;;  %s4018_s23 = sphi %s4152_s23, %s4839_s23   ;;  %s4014_s22 = sphi %s4150_s22, %s4838_s22   ;;  %s4010_s21 = sphi %s4148_s21, %s4837_s21  }
  0x1b   : > { %p2954_p0 = scmp.ge.s32.totalorder %s4030_s26, 1  ;;  %p4182_p1 = scmp.eq.s32.totalorder %s4790_s27, 0 }
  0x1c   : > { %p424_p2 = scmp.lt.s32.totalorder %s4030_s26, 3  ;;  %s4032_s30 = smov [#allocation11]  }
  0x1d   : > { %s4809_s28 = scalar_select %p4182_p1, 1, 0 }
  0x1e   : > { %p4187_p3 = pnand %p2954_p0, %p424_p2  ;;  %s437_s0 = sshll.u32 %s4032_s30, 4  ;;  %s438_s0 = int_to_ptr.vmem [resolvable:$true] %s437_s0 }
  0x1f   : > { %s4033_s17 = smov [#allocation14]   ;;  %s4034_s20 = smov [#allocation17]  }
  0x20   : > { %s4810_s29 = scalar_select %p4187_p3, 1, 0 }
  0x21   : > { %p3380_p5 = pneg %p4187_p3  ;;  %s461_s18 = sshll.u32 %s4033_s17, 4  ;;  %s462_s18 = int_to_ptr.vmem [resolvable:$true] %s461_s18 }
  0x22   : > { %s485_s27 = sshll.u32 %s4034_s20, 4  ;;  %s3623_s16 = scalar_lea.vmem %s438_s0, 16  ;;  %s4200_s27 = int_to_ptr.vmem [resolvable:$true] %s485_s27 }
  0x23   : > { %p4196_p6 = pnand %p3380_p5, %p4182_p1  ;;  %p3624_p8 = scmp.ne.s32.totalorder %s438_s0, %s3623_s16 }
  0x24   : > { %s3630_s17 = scalar_lea.vmem %s438_s0, 32  ;;  %p3631_p11 = scmp.lt.s32.totalorder %s438_s0, %s438_s0 }
  0x25   : > { %p4204_p7 = pneg %p4196_p6  ;;  %p3632_p12 = scmp.lt.s32.totalorder %s3630_s17, %s3623_s16 }
  0x27   : > { %p3626_p9 = pnand %p3624_p8, %p4204_p7  ;;  %p3633_p13 = por %p3632_p12, %p3631_p11 }
  0x29   : > { %p3627_p10 = pneg %p3626_p9 }
  0x2b   : > { %p3634_p0 = pnand %p3633_p13, %p3627_p10 }
  0x2d   : > { %3637 = shalt.err (!%p3634_p0)
}
  0x2e   : > { %s4813_s1 = sld [smem:[#allocation39_spill]]  ;;  %s3649_s14 = scalar_lea.vmem %s462_s18, 16 }
  0x2f   : > { %p3650_p2 = scmp.ne.s32.totalorder %s462_s18, %s3649_s14  ;;  %s3656_s24 = scalar_lea.vmem %s462_s18, 32 }
  0x30   : > { %p3657_p8 = scmp.lt.s32.totalorder %s462_s18, %s462_s18  ;;  %p3658_p9 = scmp.lt.s32.totalorder %s3656_s24, %s3649_s14 }
  0x31   : > { %p3652_p5 = pnand %p3650_p2, %p4204_p7 }
  0x32   : > { %p3659_p3 = por %p3658_p9, %p3657_p8 }
  0x33   : > { %p3653_p4 = pneg %p3652_p5 }
  0x34   : > { %3383 = dma.hbm_to_vmem [thread:$0]  (!%p4196_p6), %s4813_s1, 16, %s438_s0, [#allocation12]  }
  0x35   : > { %p3660_p1 = pnand %p3659_p3, %p3653_p4 }
  0x37   : > { %3663 = shalt.err (!%p3660_p1)
}
  0x38   : > { %s4814_s3 = sld [smem:[#allocation41_spill]]  ;;  %s3675_s15 = scalar_lea.vmem %s4200_s27, 16 }
  0x39   : > { %p3676_p10 = scmp.ne.s32.totalorder %s4200_s27, %s3675_s15  ;;  %s3682_s14 = scalar_lea.vmem %s4200_s27, 32 }
  0x3a   : > { %p3683_p3 = scmp.lt.s32.totalorder %s4200_s27, %s4200_s27  ;;  %p3684_p1 = scmp.lt.s32.totalorder %s3682_s14, %s3675_s15 }
  0x3b   : > { %p3678_p11 = pnand %p3676_p10, %p4204_p7 }
  0x3c   : > { %p3685_p4 = por %p3684_p1, %p3683_p3 }
  0x3d   : > { %p3679_p12 = pneg %p3678_p11 }
  0x3e   : > { %3389 = dma.hbm_to_vmem [thread:$0]  (!%p4196_p6), %s4814_s3, 16, %s462_s18, [#allocation15]  }
  0x3f   : > { %p3686_p13 = pnand %p3685_p4, %p3679_p12 }
  0x41   : > { %3689 = shalt.err (!%p3686_p13)
}
  0x42   : > { %s4815_s5 = sld [smem:[#allocation43_spill]]  ;;  %s4035_s18 = smov [#allocation20]  }
  0x43   : > { %s508_s20 = sshll.u32 %s4035_s18, 4  ;;  %s4036_s16 = smov [#allocation23]   ;;  %s509_s20 = int_to_ptr.vmem [resolvable:$true] %s508_s20 }
  0x44   : > { %s537_s17 = sshll.u32 %s4036_s16, 4  ;;  %s3701_s1 = scalar_lea.vmem %s509_s20, 256  ;;  %s538_s17 = int_to_ptr.vmem [resolvable:$true] %s537_s17 }
  0x45   : > { %p3702_p0 = scmp.ne.s32.totalorder %s509_s20, %s3701_s1  ;;  %p3709_p8 = scmp.lt.s32.totalorder %s509_s20, %s509_s20 }
  0x46   : > { %p3710_p9 = scmp.lt.s32.totalorder %s3701_s1, %s3701_s1 }
  0x47   : > { %p3704_p2 = pnand %p3702_p0, %p4204_p7 }
  0x48   : > { %3395 = dma.hbm_to_vmem [thread:$0]  (!%p4196_p6), %s4815_s5, 16, %s4200_s27, [#allocation18]  }
  0x49   : > { %p3705_p5 = pneg %p3704_p2  ;;  %p3711_p10 = por %p3710_p9, %p3709_p8 }
  0x4b   : > { %p3712_p11 = pnand %p3711_p10, %p3705_p5 }
  0x4d   : > { %3715 = shalt.err (!%p3712_p11)
}
  0x4e   : > { %s4037_s15 = smov 64   ;;  %s4038_s14 = smov 4  }
  0x4f   : > { %s4816_s7 = sld [smem:[#allocation45_spill]]  ;;  %s3727_s0 = scalar_lea.vmem %s538_s17, 256 }
  0x50   : > { %p3728_p12 = scmp.ne.s32.totalorder %s538_s17, %s3727_s0  ;;  %p3735_p4 = scmp.lt.s32.totalorder %s538_s17, %s538_s17 }
  0x51   : > { %p3736_p13 = scmp.lt.s32.totalorder %s3727_s0, %s3727_s0 }
  0x52   : > { %p3730_p3 = pnand %p3728_p12, %p4204_p7 }
  0x53   : > { %p3737_p0 = por %p3736_p13, %p3735_p4 }
  0x54   : > { %p3731_p1 = pneg %p3730_p3 }
  0x55   : > { %3401 = dma.hbm_to_vmem [thread:$0]  (!%p4196_p6), %s4816_s7, 256, %s509_s20, [#allocation21], %s4037_s15, %s4037_s15, %s4038_s14  }
  0x56   : > { %p3738_p2 = pnand %p3737_p0, %p3731_p1 }
  0x58   : > { %3741 = shalt.err (!%p3738_p2)
}
  0x59   : > { %s4817_s10 = sld [smem:[#allocation47_spill]]  ;;  %s4039_s20 = smov [#allocation13]  }
  0x5a   : > { %s447_s16 = sshll.u32 %s4039_s20, 4  ;;  %s4040_s27 = smov [#allocation16]   ;;  %s448_s16 = int_to_ptr.vmem [resolvable:$true] %s447_s16 }
  0x5b   : > { %s471_s24 = sshll.u32 %s4040_s27, 4  ;;  %s3753_s3 = scalar_lea.vmem %s448_s16, 128  ;;  %s472_s24 = int_to_ptr.vmem [resolvable:$true] %s471_s24 }
  0x5c   : > { %p3754_p5 = scmp.ne.s32.totalorder %s448_s16, %s3753_s3  ;;  %p3761_p10 = scmp.lt.s32.totalorder %s448_s16, %s448_s16 }
  0x5d   : > { %p3762_p11 = scmp.lt.s32.totalorder %s3753_s3, %s3753_s3 }
  0x5e   : > { %p3756_p8 = pnand %p3754_p5, %p4204_p7 }
  0x5f   : > { %3407 = dma.hbm_to_vmem [thread:$0]  (!%p4196_p6), %s4817_s10, 256, %s538_s17, [#allocation24], %s4037_s15, %s4037_s15, %s4038_s14  }
  0x60   : > { %p3757_p9 = pneg %p3756_p8  ;;  %p3763_p12 = por %p3762_p11, %p3761_p10 }
  0x62   : > { %p3764_p3 = pnand %p3763_p12, %p3757_p9 }
  0x64   : > { %3767 = shalt.err (!%p3764_p3)
}
  0x65   : > { %s4818_s2 = sld [smem:[#allocation40_spill]]  ;;  %s3779_s1 = scalar_lea.vmem %s472_s24, 128 }
  0x66   : > { %p3780_p1 = scmp.ne.s32.totalorder %s472_s24, %s3779_s1  ;;  %p3787_p0 = scmp.lt.s32.totalorder %s472_s24, %s472_s24 }
  0x67   : > { %p3788_p2 = scmp.lt.s32.totalorder %s3779_s1, %s3779_s1 }
  0x68   : > { %p3782_p4 = pnand %p3780_p1, %p4204_p7 }
  0x69   : > { %p3789_p5 = por %p3788_p2, %p3787_p0 }
  0x6a   : > { %p3783_p13 = pneg %p3782_p4 }
  0x6b   : > { %3386 = dma.hbm_to_vmem [thread:$0]  (!%p4196_p6), %s4818_s2, 128, %s448_s16, [#allocation12], %s4037_s15, %s4037_s15, %s4038_s14  }
  0x6c   : > { %p3790_p8 = pnand %p3789_p5, %p3783_p13 }
  0x6e   : > { %3793 = shalt.err (!%p3790_p8)
}
  0x6f   : > { %s4819_s4 = sld [smem:[#allocation42_spill]]  ;;  %s4041_s20 = smov [#allocation19]  }
  0x70   : > { %s495_s16 = sshll.u32 %s4041_s20, 4  ;;  %s4042_s27 = smov [#allocation22]   ;;  %s496_s16 = int_to_ptr.vmem [resolvable:$true] %s495_s16 }
  0x71   : > { %s521_s17 = sshll.u32 %s4042_s27, 4  ;;  %s3805_s0 = scalar_lea.vmem %s496_s16, 256  ;;  %s522_s17 = int_to_ptr.vmem [resolvable:$true] %s521_s17 }
  0x72   : > { %p3806_p9 = scmp.ne.s32.totalorder %s496_s16, %s3805_s0  ;;  %p3813_p12 = scmp.lt.s32.totalorder %s496_s16, %s496_s16 }
  0x73   : > { %p3814_p3 = scmp.lt.s32.totalorder %s3805_s0, %s3805_s0 }
  0x74   : > { %p3808_p10 = pnand %p3806_p9, %p4204_p7 }
  0x75   : > { %3392 = dma.hbm_to_vmem [thread:$0]  (!%p4196_p6), %s4819_s4, 128, %s472_s24, [#allocation15], %s4037_s15, %s4037_s15, %s4038_s14  }
  0x76   : > { %p3809_p11 = pneg %p3808_p10  ;;  %p3815_p1 = por %p3814_p3, %p3813_p12 }
  0x78   : > { %p3816_p4 = pnand %p3815_p1, %p3809_p11 }
  0x7a   : > { %3819 = shalt.err (!%p3816_p4)
}
  0x7b   : > { %s4820_s6 = sld [smem:[#allocation44_spill]]  ;;  %s3831_s3 = scalar_lea.vmem %s522_s17, 256 }
  0x7c   : > { %p3832_p13 = scmp.ne.s32.totalorder %s522_s17, %s3831_s3  ;;  %p3839_p5 = scmp.lt.s32.totalorder %s522_s17, %s522_s17 }
  0x7d   : > { %p3840_p8 = scmp.lt.s32.totalorder %s3831_s3, %s3831_s3 }
  0x7e   : > { %p3834_p0 = pnand %p3832_p13, %p4204_p7 }
  0x7f   : > { %p3841_p9 = por %p3840_p8, %p3839_p5 }
  0x80   : > { %p3835_p2 = pneg %p3834_p0 }
  0x81   : > { %3398 = dma.hbm_to_vmem [thread:$0]  (!%p4196_p6), %s4820_s6, 256, %s496_s16, [#allocation18], %s4037_s15, %s4037_s15, %s4038_s14  }
  0x82   : > { %p3842_p10 = pnand %p3841_p9, %p3835_p2 }
  0x84   : > { %3845 = shalt.err (!%p3842_p10)
}
  0x85   : > { %s4821_s8 = sld [smem:[#allocation46_spill]]  ;;  %s4043_s16 = smov [#allocation25]  }
  0x86   : > { %s550_s27 = sshll.u32 %s4043_s16, 4  ;;  %s4044_s0 = smov [#allocation26]   ;;  %s551_s27 = int_to_ptr.vmem [resolvable:$true] %s550_s27 }
  0x87   : > { %s563_s24 = sshll.u32 %s4044_s0, 4  ;;  %s3857_s1 = scalar_lea.vmem %s551_s27, 256  ;;  %s564_s24 = int_to_ptr.vmem [resolvable:$true] %s563_s24 }
  0x88   : > { %p3858_p11 = scmp.ne.s32.totalorder %s551_s27, %s3857_s1  ;;  %p3865_p1 = scmp.lt.s32.totalorder %s551_s27, %s551_s27 }
  0x89   : > { %p3866_p4 = scmp.lt.s32.totalorder %s3857_s1, %s3857_s1 }
  0x8a   : > { %p3860_p12 = pnand %p3858_p11, %p4204_p7 }
  0x8b   : > { %3404 = dma.hbm_to_vmem [thread:$0]  (!%p4196_p6), %s4821_s8, 256, %s522_s17, [#allocation21], %s4037_s15, %s4037_s15, %s4038_s14  }
  0x8c   : > { %p3861_p3 = pneg %p3860_p12  ;;  %p3867_p13 = por %p3866_p4, %p3865_p1 }
  0x8e   : > { %p3868_p0 = pnand %p3867_p13, %p3861_p3 }
  0x90   : > { %3871 = shalt.err (!%p3868_p0)
}
  0x91   : > { %3410 = dma.hbm_to_vmem [thread:$0]  (!%p4196_p6), %s4784_s11, 256, %s551_s27, [#allocation24], %s4037_s15, %s4037_s15, %s4038_s14  }
  0x92   : > { %s3883_s18 = scalar_lea.vmem %s564_s24, 256  ;;  %p3891_p9 = scmp.lt.s32.totalorder %s564_s24, %s564_s24 }
  0x93   : > { %p3884_p2 = scmp.ne.s32.totalorder %s564_s24, %s3883_s18  ;;  %p3892_p10 = scmp.lt.s32.totalorder %s3883_s18, %s3883_s18 }
  0x95   : > { %p3886_p5 = pnand %p3884_p2, %p4204_p7  ;;  %p3893_p11 = por %p3892_p10, %p3891_p9 }
  0x97   : > { %p3887_p8 = pneg %p3886_p5 }
  0x99   : > { %p3894_p12 = pnand %p3893_p11, %p3887_p8 }
  0x9b   : > { %3897 = shalt.err (!%p3894_p12)
}
  0x9c   : > { %3413 = dma.hbm_to_vmem [thread:$0]  (!%p4196_p6), %s4785_s12, 256, %s564_s24, [#allocation27], %s4037_s15, %s4037_s15, %s4038_s14  }
  0x9d   : > { %s2953_s19 = sadd.s32 4294967294, %s4030_s26   ;;  %s50_s30 = sadd.s32 1, %s4026_s25 }
  0x9e   : > { %s57_s27 = sadd.s32 1, %s4018_s23  ;;  %p52_p7 = scmp.ge.s32.totalorder %s50_s30, 2 }
  0x9f   : > { %p64_p3 = scmp.ne.s32.totalorder %s4018_s23, %s4014_s22  ;;  %p65_p1 = scmp.eq.s32.totalorder %s4030_s26, 0 }
  0xa0   : > { %p70_p4 = scmp.ne.s32.totalorder %s4014_s22, %s4010_s21  ;;  %s4843_s30 = smov (%p52_p7, %s50_s30), 0 }
  0xa1   : > { %p4325_p13 = por %p65_p1, %p64_p3  ;;  %p4823_p0 = scmp.ne.s32.totalorder %s4809_s28, 0 }
  0xa2   : > { %s54_s14 = ssub.s32 %s4026_s25, %s4843_s30  ;;  %s4825_s24 = sadd.s32 4294967295, %s4030_s26  }
  0xa3   : > { %p4331_p6 = por %p4823_p0, %p70_p4  ;;  %p411_p2 = scmp.eq.s32.totalorder %s4825_s24, 1 }
  0xa4   : > { %p55_p5 = scmp.eq.s32.totalorder %s54_s14, 0  ;;  %p417_p8 = scmp.eq.s32.totalorder %s2953_s19, 1 }
  0xa5   : > { %p4339_p9 = por %p411_p2, %p64_p3  ;;  %p3433_p10 = scmp.lt.s32.totalorder %s4030_s26, 2 }
  0xa6   : > { %s4345_s17 = scalar_select %p55_p5, %s4018_s23, %s57_s27  }
  0xa7   : > { %p4347_p11 = por %p417_p8, %p70_p4  ;;  %s586_s18 = sand.u32 1, %s4018_s23  }
  0xa8   : > { %s2967_s20 = sshll.u32 %s586_s18, 2  ;;  %s2968_s16 = sshll.u32 %s4026_s25, 6 }
  0xa9   : > { %s4828_s5 = sld [smem:[#allocation38_spill]]  ;;  %s590_s14 = scalar_lea.vmem [#allocation8], %s2967_s20 }
  0xaa   : > { %s597_s19 = sshll.u32 %s590_s14, 4  ;;  %p4358_p12 = pnand %p3433_p10, %p4325_p13  ;;  %s598_s19 = int_to_ptr.vmem [resolvable:$true] %s597_s19 }
  0xab   : > { %s587_s27 = scalar_lea.sflag [#allocation9], %s586_s18  ;;  %s3911_s7 = scalar_lea.vmem %s598_s19, 64 }
  0xac   : > { %p3900_p7 = pneg %p4358_p12  ;;  %p3912_p3 = scmp.ne.s32.totalorder %s598_s19, %s3911_s7 }
  0xad   : > { %s4045_s8 = smov [#allocation8]  }
  0xae   : > { %p3914_p1 = pnand %p3912_p3, %p3900_p7  ;;  %s3916_s10 = sshll.u32 %s4045_s8, 4  ;;  %s3917_s10 = int_to_ptr.vmem [resolvable:$false] %s3916_s10 }
  0xaf   : > { %s595_s24 = scalar_lea.hbm %s4828_s5, %s2968_s16  ;;  %s3918_s2 = scalar_lea.vmem %s3917_s10, 128 }
  0xb0   : > { %p3915_p4 = pneg %p3914_p1  ;;  %p3919_p0 = scmp.lt.s32.totalorder %s598_s19, %s3917_s10 }
  0xb1   : > { %p3920_p2 = scmp.lt.s32.totalorder %s3918_s2, %s3911_s7 }
  0xb3   : > { %p3921_p5 = por %p3920_p2, %p3919_p0 }
  0xb5   : > { %p3922_p8 = pnand %p3921_p5, %p3915_p4 }
  0xb7   : > { %3925 = shalt.err (!%p3922_p8)
}
  0xb8   : > { %3417 = dma.hbm_to_vmem [thread:$0]  (!%p4358_p12), %s595_s24, 64, %s598_s19, %s587_s27  }
  0xb9   : > { %p4830_p13 = scmp.ne.s32.totalorder %s4810_s29, 0 }
  0xba   : > { %s4369_s4 = sand.u32 (!%p4830_p13), 1, %s4014_s22  }
  0xbb   : > { %606 = sbr.rel (%p4830_p13) target bundleno = 5763 (0x1683), region = 84  ;;  %s2970_s5 = sshll.u32 (!%p4830_p13), %s4369_s4, 2 }
  0xbc   : > { %s609_s8 = scalar_lea.sflag (!%p4830_p13), [#allocation9], %s4369_s4  ;;  %s612_s0 = scalar_lea.vmem (!%p4830_p13), [#allocation8], %s2970_s5 }
  0xc0   : > { %3977 = dma.done.wait (%p4331_p6), %s609_s8, 64  }
  0xc1   : > { %3979 = vsyncadd (%p4331_p6), %s609_s8, 4294967232  ;;  %p4831_p10 = scmp.ne.s32.totalorder %s4809_s28, 0 }
  0xc3   : > { %3981 = dma.done.wait (%p4831_p10), [#allocation12], 144  }
  0xc4   : > { %3983 = vsyncadd (%p4831_p10), [#allocation12], 4294967152 }
  0xc5   : > { %3985 = dma.done.wait (%p4831_p10), [#allocation15], 144  }
  0xc6   : > { %3987 = vsyncadd (%p4831_p10), [#allocation15], 4294967152 }
  0xc7   : > { %3989 = dma.done.wait (%p4831_p10), [#allocation18], 272  }
  0xc8   : > { %3991 = vsyncadd (%p4831_p10), [#allocation18], 4294967024 }
  0xc9   : > { %3993 = dma.done.wait (%p4831_p10), [#allocation21], 512  }
  0xca   : > { %3995 = vsyncadd (%p4831_p10), [#allocation21], 4294966784 }
  0xcb   : > { %3997 = dma.done.wait (%p4831_p10), [#allocation24], 512  }
  0xcc   : > { %3999 = vsyncadd (%p4831_p10), [#allocation24], 4294966784 }
  0xcd   : > { %4001 = dma.done.wait (%p4831_p10), [#allocation27], 256  }
  0xce   : > { %4003 = vsyncadd (%p4831_p10), [#allocation27], 4294967040  ;;  %v4046_v0 = vmov 0.0   ;;  %vm4047_vm0 = vmmov 0   ;;  %v3523_v1 = vld [vmem:[#allocation13] sm:$0xff]   ;;  %v3524_v5 = vld [vmem:[#allocation16] sm:$0xff]  }
  0xcf   : > { %3120 = vmatprep.subr.bf16.mxu0 %v4046_v0  ;;  %3122 = vmatprep.mubr.msk.bf16.mxu0 %vm4047_vm0, %v4046_v0  ;;  %v710_v2 = vld [vmem:[%s612_s0] sm:$0xf]  ;;  %v2983_v3 = vld [vmem:[#allocation11] ss:$0 sm:$0xff]  ;;  %vm736_vm1 = vcmask 130048   ;;  %s4048_s6 = smov 112  }
  0xd0   : > { %3126 = vmatprep.subr.bf16.mxu1 %v4046_v0  ;;  %3128 = vmatprep.mubr.msk.bf16.mxu1 %vm4047_vm0, %v4046_v0  ;;  %v711_v4 = vunpack.c.l.bf16 %v710_v2  ;;  %v3525_v6 = vld [vmem:[#allocation19 + $0x8] sm:$0xff]   ;;  %v3526_v9 = vld [vmem:[#allocation19] sm:$0xff]   ;;  %v2984_v13 = vld [vmem:[#allocation14] ss:$0 sm:$0xff]  ;;  %vm859_vm2 = vcmask 261120   ;;  %vm904_vm3 = vcmask 257024  }
  0xd1   : > { %3121 = vmatpush3.bf16.msra.mxu0 %v3523_v1  ;;  %3127 = vmatpush3.bf16.msra.mxu1 %v3524_v5  ;;  %v3529_v10 = vld [vmem:[%s4782_s9 + $0x8] sm:$0xff]   ;;  %v3531_v12 = vld [vmem:[%s4782_s9] sm:$0xff]   ;;  %v3528_v20 = vld [vmem:[#allocation20] sm:$0xff]   ;;  %vm1203_vm4 = vcmask 31744   ;;  %vm1326_vm5 = vcmask 1043456   ;;  %vm1296_vm6 = vcmask 64512  }
  0xd2   : > { %3132 = vmatprep.subr.bf16.mxu0 %v4046_v0  ;;  %v719_v7 = vadd.f32 %v2983_v3, %v711_v4  ;;  %3140 = vmatprep.subr.bf16.mxu1 %v4046_v0  ;;  %v3527_v16 = vld [vmem:[#allocation20 + $0x8] sm:$0xff]   ;;  %v3530_v22 = vld [vmem:[#allocation25 + $0x8] sm:$0xff]   ;;  %v3532_v23 = vld [vmem:[#allocation25] sm:$0xff]   ;;  %s4049_s15 = smov 124   ;;  %s4050_s18 = smov 120   ;;  %vm2633_vm7 = vcmask 97280  }
  0xd3   : > { %v2987_v24 = vld [vmem:[#allocation17] ss:$0 sm:$0xff]  ;;  %v3534_v32 = vld [vmem:[#allocation23] sm:$0xff]   ;;  %v3535_v33 = vld [vmem:[#allocation22 + $0x8] sm:$0xff]   ;;  %s4051_s20 = smov 116   ;;  %s4052_s16 = smov 108  }
  0xd4   : > { %v720_v8 = vpack.c.bf16 %v719_v7, %v719_v7  ;;  %v3533_v28 = vld [vmem:[#allocation23 + $0x8] sm:$0xff]   ;;  %v3536_v34 = vld [vmem:[#allocation22] sm:$0xff]   ;;  %s4053_s24 = smov 104   ;;  %s4054_s14 = smov 100   ;;  %vm2637_vm8 = vcmask 162816   ;;  %vm2639_vm9 = vcmask 195584  }
  0xd5   : > { %s4055_s19 = smov 12   ;;  %s4056_s27 = smov 20   ;;  %vm2641_vm10 = vcmask 228352  }
  0xd6   : > { %791 = vrot.lane.b32.xlu0 %v720_v8, %s4048_s6  ;;  %3123 = vmatmul.mubr.msk.bf16.vlgmr.msra.gmra.mxu0 %vm736_vm1, %v720_v8  ;;  %s4057_s2 = smov 4   ;;  %s4058_s5 = smov 8  }
  0xd7   : > { %3133 = vmatpush3.bf16.msra.mxu0 %v3525_v6  ;;  %3136 = vmatprep.mubr.msk.bf16.mxu0 %vm4047_vm0, %v4046_v0  ;;  %s4059_s8 = smov 16   ;;  %s4060_s0 = smov 24  }
  0xd8   : > { %3134 = vmatprep.subr.bf16.mxu0 %v4046_v0  ;;  %s4832_s28 = sld [smem:[#allocation37_spill]]  ;;  %s2982_s29 = sshll.u32 %s4369_s4, 3 }
  0xd9   : > { %s2754_s7 = scalar_lea.sflag [#allocation10], %s4369_s4 }
  0xdb   : > { %3135 = vmatpush3.bf16.msra.mxu0 %v3526_v9 }
  0xdc   : > { %3148 = vmatprep.subr.bf16.mxu0 %v4046_v0 }
 0x148   : > { %v792_v11 = vpop.permute.xlu0 %791 }
 0x149   : > { %3129 = vmatmul.mubr.msk.bf16.vlgmr.msra.gmra.mxu1 %vm736_vm1, %v792_v11 }
 0x14a   : > { %3141 = vmatpush3.bf16.msra.mxu1 %v3529_v10  ;;  %3144 = vmatprep.mubr.msk.bf16.mxu1 %vm4047_vm0, %v4046_v0 }
 0x14b   : > { %3142 = vmatprep.subr.bf16.mxu1 %v4046_v0 }
 0x14e   : > { %3143 = vmatpush3.bf16.msra.mxu1 %v3531_v12 }
 0x14f   : > { %3156 = vmatprep.subr.bf16.mxu1 %v4046_v0 }
 0x196   : > { %v774_v14 = vpop.f32.mrf.mxu0 }
 0x197   : > { %v775_v15 = vadd.f32 %v2984_v13, %v774_v14 }
 0x198   : > { %v3124_v17 = vpop.f32.mrf.mxu0 }
 0x199   : > { %v780_v18 = vpack.c.bf16 %v775_v15, %v775_v15 }
 0x19a   : > { %v777_v19 = vpop.f32.mrf.mxu0 }
 0x19b   : > { %3137 = vmatmul.mubr.msk.bf16.vlgmr.msra.gmra.mxu0 %vm859_vm2, %v780_v18 }
 0x19c   : > { %3149 = vmatpush3.bf16.msra.mxu0 %v3527_v16  ;;  %3152 = vmatprep.mubr.msk.bf16.mxu0 %vm4047_vm0, %v4046_v0  ;;  %v3125_v21 = vpop.f32.mrf.mxu0 }
 0x19d   : > { %3150 = vmatprep.subr.bf16.mxu0 %v4046_v0 }
 0x1a0   : > { %3151 = vmatpush3.bf16.msra.mxu0 %v3528_v20 }
 0x1a1   : > { %3164 = vmatprep.subr.bf16.mxu0 %v4046_v0 }
 0x1a3   : > { %3153 = vmatmul.mubr.msk.bf16.vlgmr.msra.gmra.mxu0 %vm859_vm2, %v780_v18 }
 0x1a4   : > { %3165 = vmatpush3.bf16.msra.mxu0 %v3530_v22  ;;  %3168 = vmatprep.mubr.msk.bf16.mxu0 %vm4047_vm0, %v4046_v0 }
 0x1a5   : > { %3166 = vmatprep.subr.bf16.mxu0 %v4046_v0 }
 0x1a8   : > { %3167 = vmatpush3.bf16.msra.mxu0 %v3532_v23 }
 0x1a9   : > { %3180 = vmatprep.subr.bf16.mxu0 %v4046_v0 }
 0x209   : > { %v836_v25 = vpop.f32.mrf.mxu1 }
 0x20a   : > { %v837_v26 = vadd.f32 %v2987_v24, %v836_v25 }
 0x20b   : > { %v3130_v27 = vpop.f32.mrf.mxu1 }
 0x20c   : > { %v842_v29 = vpack.c.bf16 %v837_v26, %v837_v26 }
 0x20d   : > { %v839_v30 = vpop.f32.mrf.mxu1 }
 0x20e   : > { %3145 = vmatmul.mubr.msk.bf16.vlgmr.msra.gmra.mxu1 %vm859_vm2, %v842_v29  ;;  %3169 = vmatmul.mubr.msk.bf16.vlgmr.msra.gmra.mxu0 %vm859_vm2, %v842_v29 }
 0x20f   : > { %v3131_v31 = vpop.f32.mrf.mxu1  ;;  %3157 = vmatpush3.bf16.msra.mxu1 %v3533_v28  ;;  %3160 = vmatprep.mubr.msk.bf16.mxu1 %vm4047_vm0, %v4046_v0 }
 0x210   : > { %3158 = vmatprep.subr.bf16.mxu1 %v4046_v0  ;;  %3182 = vmatprep.mubr.msk.bf16.mxu0 %vm4047_vm0, %v4046_v0 }
 0x213   : > { %3159 = vmatpush3.bf16.msra.mxu1 %v3534_v32 }
 0x214   : > { %3172 = vmatprep.subr.bf16.mxu1 %v4046_v0 }
 0x216   : > { %3161 = vmatmul.mubr.msk.bf16.vlgmr.msra.gmra.mxu1 %vm859_vm2, %v842_v29 }
 0x217   : > { %3173 = vmatpush3.bf16.msra.mxu1 %v3535_v33  ;;  %3176 = vmatprep.mubr.msk.bf16.mxu1 %vm4047_vm0, %v4046_v0 }
 0x218   : > { %3174 = vmatprep.subr.bf16.mxu1 %v4046_v0 }
 0x21b   : > { %3175 = vmatpush3.bf16.msra.mxu1 %v3536_v34 }
 0x21c   : > { %3186 = vmatprep.subr.bf16.mxu1 %v4046_v0 }
 0x21e   : > { %3177 = vmatmul.mubr.msk.bf16.vlgmr.msra.gmra.mxu1 %vm859_vm2, %v780_v18 }
 0x21f   : > { %3188 = vmatprep.mubr.msk.bf16.mxu1 %vm4047_vm0, %v4046_v0 }
 0x25b   : > { %v897_v35 = vpop.f32.mrf.mxu0 }
 0x25c   : > { %v903_v36 = vpack.c.bf16 %v897_v35, %v897_v35 }
 0x25d   : > { %v3138_v37 = vpop.f32.mrf.mxu0 }
 0x25e   : > { %905 = vst.msk [vmem:[#allocation2] sm:$0xf] %vm904_vm3, %v903_v36 }
 0x25f   : > { %v900_v38 = vpop.f32.mrf.mxu0 }
 0x261   : > { %v3139_v39 = vpop.f32.mrf.mxu0 }
 0x263   : > { %v1017_v40 = vpop.f32.mrf.mxu0 }
 0x264   : > { %v1023_v41 = vpack.c.bf16 %v1017_v40, %v1017_v40 }
 0x265   : > { %v3154_v42 = vpop.f32.mrf.mxu0  ;;  %v4456_v47 = vld [vmem:[#allocation2] sm:$0xf] }
 0x266   : > { %1024 = vst.msk [vmem:[#allocation4] sm:$0xf] %vm904_vm3, %v1023_v41  ;;  %v4495_v36 = vcombine.low %v4456_v47, %v4456_v47 }
 0x267   : > { %v1020_v43 = vpop.f32.mrf.mxu0 }
 0x269   : > { %v3155_v44 = vpop.f32.mrf.mxu0 }
 0x26d   : > { %v1200_v45 = vld [vmem:[#allocation4] sm:$0xf] }
 0x26e   : > { %v1208_v46 = vsel %vm1203_vm4, %v1200_v45, 0  ;;  %v4481_v22 = vcombine.low %v1200_v45, %v1200_v45 }
 0x26f   : > { %3181 = vmatpush3.bf16.xpose.msra.mxu0 %v1208_v46 }
 0x270   : > { %3192 = vmatprep.subr.bf16.mxu0 %v4046_v0 }
 0x276   : > { %3183 = vmatmul.mubr.msk.bf16.vlgmr.msra.gmra.mxu0 %vm1203_vm4, %v4456_v47 }
 0x277   : > { %3194 = vmatprep.mubr.msk.bf16.mxu0 %vm4047_vm0, %v4046_v0 }
 0x2ce   : > { %v959_v48 = vpop.f32.mrf.mxu1  ;;  %v1137_v49 = vpop.f32.mrf.mxu0 }
 0x2cf   : > { %v965_v50 = vpack.c.bf16 %v959_v48, %v959_v48 }
 0x2d0   : > { %v3146_v51 = vpop.f32.mrf.mxu1  ;;  %v3170_v52 = vpop.f32.mrf.mxu0 }
 0x2d1   : > { %966 = vst.msk [vmem:[#allocation3] sm:$0xf] %vm904_vm3, %v965_v50 }
 0x2d2   : > { %v962_v53 = vpop.f32.mrf.mxu1  ;;  %v1140_v54 = vpop.f32.mrf.mxu0 }
 0x2d4   : > { %v3147_v55 = vpop.f32.mrf.mxu1  ;;  %v3171_v56 = vpop.f32.mrf.mxu0 }
 0x2d6   : > { %v1075_v57 = vpop.f32.mrf.mxu1 }
 0x2d7   : > { %v1081_v58 = vpack.c.bf16 %v1075_v57, %v1075_v57 }
 0x2d8   : > { %v3162_v59 = vpop.f32.mrf.mxu1  ;;  %v1199_v8 = vld [vmem:[#allocation3] sm:$0xf] }
 0x2d9   : > { %1082 = vst.msk [vmem:[#allocation5] sm:$0xf] %vm904_vm3, %v1081_v58  ;;  %v4476_v16 = vcombine.low %v1199_v8, %v1199_v8 }
 0x2da   : > { %v1078_v60 = vpop.f32.mrf.mxu1 }
 0x2dc   : > { %v3163_v61 = vpop.f32.mrf.mxu1 }
 0x2de   : > { %v1189_v62 = vpop.f32.mrf.mxu1 }
 0x2df   : > { %v1190_v63 = vadd.f32 %v1189_v62, %v1137_v49 }
 0x2e0   : > { %v3178_v1 = vpop.f32.mrf.mxu1  ;;  %v1201_v2 = vld [vmem:[#allocation5] sm:$0xf] }
 0x2e1   : > { %v1195_v3 = vmul.f32 0.5, %v1190_v63  ;;  %v1254_v4 = vsel %vm1203_vm4, %v1201_v2, 0  ;;  %v4489_v35 = vcombine.low %v1201_v2, %v1201_v2 }
 0x2e2   : > { %v1192_v5 = vpop.f32.mrf.mxu1  ;;  %3187 = vmatpush3.bf16.xpose.msra.mxu1 %v1254_v4 }
 0x2e3   : > { %v1196_v6 = vpack.c.bf16 %v1195_v3, %v1195_v3  ;;  %3198 = vmatprep.subr.bf16.mxu1 %v4046_v0 }
 0x2e4   : > { %v3179_v7 = vpop.f32.mrf.mxu1 }
 0x2e5   : > { %1197 = vst.msk [vmem:[#allocation6] sm:$0xf] %vm904_vm3, %v1196_v6 }
 0x2e9   : > { %3189 = vmatmul.mubr.msk.bf16.vlgmr.msra.gmra.mxu1 %vm1203_vm4, %v1199_v8 }
 0x2ea   : > { %3200 = vmatprep.mubr.msk.bf16.mxu1 %vm4047_vm0, %v4046_v0 }
 0x2ec   : > { %v4470_v9 = vld [vmem:[#allocation6] sm:$0xf] }
 0x2ed   : > { %v1328_v10 = vsel %vm1326_vm5, %v4470_v9, 0  ;;  %v4521_v8 = vcombine.low %v4470_v9, %v4470_v9 }
 0x2ee   : > { %3193 = vmatpush3.bf16.msra.mxu0 %v1328_v10 }
 0x2ef   : > { %3204 = vmatprep.subr.bf16.mxu0 %v4046_v0 }
 0x336   : > { %v1244_v11 = vpop.f32.mrf.mxu0 }
 0x337   : > { %v1297_v12 = vsel %vm1296_vm6, %v1244_v11, -inf }
 0x338   : > { %1298 = vmax.xlane.f32.xlu0 %v1297_v12  ;;  %v3184_v13 = vpop.f32.mrf.mxu0 }
 0x33a   : > { %v1247_v14 = vpop.f32.mrf.mxu0 }
 0x33c   : > { %v3185_v15 = vpop.f32.mrf.mxu0 }
 0x34e   : > { %1429 = vrot.lane.b32.xlu0 %v4476_v16, %s4049_s15 }
 0x3a9   : > { %v1290_v17 = vpop.f32.mrf.mxu1 }
 0x3aa   : > { %v1309_v18 = vsel %vm1296_vm6, %v1290_v17, -inf }
 0x3ab   : > { %1310 = vmax.xlane.f32.xlu1 %v1309_v18  ;;  %v3190_v19 = vpop.f32.mrf.mxu1 }
 0x3ad   : > { %v1293_v20 = vpop.f32.mrf.mxu1 }
 0x3af   : > { %v3191_v21 = vpop.f32.mrf.mxu1 }
 0x3bc   : > { %1378 = vrot.lane.b32.xlu1 %v4481_v22, %s4049_s15 }
 0x3c1   : > { %v1299_v23 = vpop.xlane.xlu0 %1298 }
 0x3c2   : > { %v1300_v24 = vsub.f32 %v1244_v11, %v1299_v23 }
 0x3c4   : > { %v1301_v25 = vmul.f32 1.442695, %v1300_v24 }
 0x3c5   : > { %v1430_v48 = vpop.permute.xlu0 %1429 }
 0x3c6   : > { %3544 = vpow2.f32 %v1301_v25 }
 0x3d3   : > { %v3545_v26 = vpop.eup %3544 }
 0x3d4   : > { %v1303_v27 = vsel %vm1296_vm6, %v3545_v26, 0.0 }
 0x3e0   : > { %1304 = vadd.xlane.f32.xlu1 %v1303_v27 }
 0x434   : > { %v1311_v28 = vpop.xlane.xlu1 %1310 }
 0x435   : > { %v1312_v29 = vsub.f32 %v1290_v17, %v1311_v28 }
 0x437   : > { %v1313_v30 = vmul.f32 1.442695, %v1312_v29 }
 0x438   : > { %v1379_v31 = vpop.permute.xlu1 %1378 }
 0x439   : > { %3546 = vpow2.f32 %v1313_v30  ;;  %v1384_v32 = vsel %vm1203_vm4, %v1379_v31, 0 }
 0x43a   : > { %3199 = vmatpush3.bf16.xpose.msra.mxu1 %v1384_v32 }
 0x43b   : > { %3210 = vmatprep.subr.bf16.mxu1 %v4046_v0 }
 0x446   : > { %v3547_v33 = vpop.eup %3546 }
 0x447   : > { %v1315_v34 = vsel %vm1296_vm6, %v3547_v33, 0.0 }
 0x448   : > { %1316 = vadd.xlane.f32.xlu1 %v1315_v34 }
 0x459   : > { %1434 = vrot.lane.b32.xlu1 %v4489_v35, %s4049_s15 }
 0x45d   : > { %1373 = vrot.lane.b32.xlu1 %v4495_v36, %s4049_s15 }
 0x469   : > { %v1305_v37 = vpop.xlane.xlu1 %1304 }
 0x46a   : > { %3548 = vrcp.f32 %v1305_v37 }
 0x477   : > { %v3549_v41 = vpop.eup %3548 }
 0x478   : > { %v1308_v43 = vmul.f32 %v3549_v41, %v3545_v26 }
 0x4d1   : > { %v1317_v38 = vpop.xlane.xlu1 %1316 }
 0x4d2   : > { %3550 = vrcp.f32 %v1317_v38 }
 0x4d5   : > { %v1435_v39 = vpop.permute.xlu1 %1434 }
 0x4d6   : > { %v1440_v47 = vsel %vm1203_vm4, %v1435_v39, 0 }
 0x4d9   : > { %v1374_v40 = vpop.permute.xlu1 %1373 }
 0x4da   : > { %3201 = vmatmul.mubr.msk.bf16.vlgmr.msra.gmra.mxu1 %vm1203_vm4, %v1374_v40 }
 0x4db   : > { %3212 = vmatprep.mubr.msk.bf16.mxu1 %vm4047_vm0, %v4046_v0 }
 0x4df   : > { %v3551_v42 = vpop.eup %3550 }
 0x4e0   : > { %v1320_v44 = vmul.f32 %v3551_v42, %v3547_v33 }
 0x4e2   : > { %v1321_v45 = vsub.f32 %v1308_v43, %v1320_v44 }
 0x4e4   : > { %v1322_v46 = vpack.c.bf16 %v1321_v45, %v1321_v45 }
 0x4e6   : > { %3195 = vmatmul.mubr.msk.bf16.vlgmr.msra.gmra.mxu0 %vm1296_vm6, %v1322_v46 }
 0x4e7   : > { %3205 = vmatpush3.bf16.xpose.msra.mxu0 %v1440_v47  ;;  %3206 = vmatprep.mubr.msk.bf16.mxu0 %vm4047_vm0, %v4046_v0 }
 0x4e8   : > { %3216 = vmatprep.subr.bf16.mxu0 %v4046_v0 }
 0x4ee   : > { %3207 = vmatmul.mubr.msk.bf16.vlgmr.msra.gmra.mxu0 %vm1203_vm4, %v1430_v48 }
 0x4ef   : > { %3218 = vmatprep.mubr.msk.bf16.mxu0 %vm4047_vm0, %v4046_v0 }
 0x59a   : > { %v1420_v49 = vpop.f32.mrf.mxu1 }
 0x59b   : > { %v1482_v50 = vsel %vm1296_vm6, %v1420_v49, -inf }
 0x59c   : > { %1483 = vmax.xlane.f32.xlu1 %v1482_v50  ;;  %v3202_v51 = vpop.f32.mrf.mxu1 }
 0x59e   : > { %v1423_v52 = vpop.f32.mrf.mxu1 }
 0x5a0   : > { %v3203_v53 = vpop.f32.mrf.mxu1 }
 0x5a6   : > { %v4511_v54 = vpop.f32.mrf.mxu0 }
 0x5a8   : > { %v3196_v55 = vpop.f32.mrf.mxu0 }
 0x5aa   : > { %v1367_v56 = vpop.f32.mrf.mxu0 }
 0x5ac   : > { %v3197_v57 = vpop.f32.mrf.mxu0 }
 0x5ae   : > { %v1476_v58 = vpop.f32.mrf.mxu0 }
 0x5af   : > { %v1494_v59 = vsel %vm1296_vm6, %v1476_v58, -inf }
 0x5b0   : > { %1495 = vmax.xlane.f32.xlu0 %v1494_v59  ;;  %v3208_v60 = vpop.f32.mrf.mxu0 }
 0x5b2   : > { %v1479_v61 = vpop.f32.mrf.mxu0 }
 0x5b4   : > { %v3209_v62 = vpop.f32.mrf.mxu0 }
 0x5c6   : > { %1561 = vrot.lane.b32.xlu0 %v4481_v22, %s4050_s18 }
 0x625   : > { %v1484_v63 = vpop.xlane.xlu1 %1483 }
 0x626   : > { %v1485_v1 = vsub.f32 %v1420_v49, %v1484_v63 }
 0x628   : > { %v1486_v2 = vmul.f32 1.442695, %v1485_v1 }
 0x62a   : > { %3552 = vpow2.f32 %v1486_v2 }
 0x637   : > { %v3553_v3 = vpop.eup %3552 }
 0x638   : > { %v1488_v4 = vsel %vm1296_vm6, %v3553_v3, 0.0 }
 0x639   : > { %1489 = vadd.xlane.f32.xlu1 %v1488_v4  ;;  %v1496_v5 = vpop.xlane.xlu0 %1495 }
 0x63a   : > { %v1497_v10 = vsub.f32 %v1476_v58, %v1496_v5 }
 0x63c   : > { %v1498_v11 = vmul.f32 1.442695, %v1497_v10 }
 0x63d   : > { %v1562_v6 = vpop.permute.xlu0 %1561 }
 0x63e   : > { %v1567_v7 = vsel %vm1203_vm4, %v1562_v6, 0  ;;  %3554 = vpow2.f32 %v1498_v11 }
 0x63f   : > { %3217 = vmatpush3.bf16.xpose.msra.mxu0 %v1567_v7 }
 0x640   : > { %3228 = vmatprep.subr.bf16.mxu0 %v4046_v0 }
 0x64a   : > { %1511 = vrot.lane.b32.xlu1 %v4521_v8, %s4049_s15  ;;  %s4062_s15 = smov [#allocation28]  }
 0x64b   : > { %v3555_v12 = vpop.eup %3554 }
 0x64c   : > { %v1500_v13 = vsel %vm1296_vm6, %v3555_v12, 0.0 }
 0x64e   : > { %1611 = vrot.lane.b32.xlu1 %v4489_v35, %s4050_s18 }
 0x672   : > { %1501 = vadd.xlane.f32.xlu1 %v1500_v13 }
 0x683   : > { %1559 = vrot.lane.b32.xlu1 %v4495_v36, %s4050_s18 }
 0x687   : > { %1609 = vrot.lane.b32.xlu1 %v4476_v16, %s4050_s18 }
 0x6c2   : > { %v1490_v9 = vpop.xlane.xlu1 %1489 }
 0x6c3   : > { %3556 = vrcp.f32 %v1490_v9 }
 0x6c6   : > { %v1512_v14 = vpop.permute.xlu1 %1511 }
 0x6c7   : > { %v1517_v15 = vsel %vm1326_vm5, %v1512_v14, 0 }
 0x6c8   : > { %3211 = vmatpush3.bf16.msra.mxu1 %v1517_v15 }
 0x6c9   : > { %3222 = vmatprep.subr.bf16.mxu1 %v4046_v0 }
 0x6ca   : > { %v1612_v17 = vpop.permute.xlu1 %1611 }
 0x6cb   : > { %v1617_v27 = vsel %vm1203_vm4, %v1612_v17, 0 }
 0x6d0   : > { %v3557_v20 = vpop.eup %3556 }
 0x6d1   : > { %v1493_v23 = vmul.f32 %v3557_v20, %v3553_v3 }
 0x6fb   : > { %v1502_v18 = vpop.xlane.xlu1 %1501 }
 0x6fc   : > { %3558 = vrcp.f32 %v1502_v18 }
 0x6ff   : > { %v1560_v19 = vpop.permute.xlu1 %1559 }
 0x700   : > { %3219 = vmatmul.mubr.msk.bf16.vlgmr.msra.gmra.mxu0 %vm1203_vm4, %v1560_v19 }
 0x701   : > { %3230 = vmatprep.mubr.msk.bf16.mxu0 %vm4047_vm0, %v4046_v0 }
 0x703   : > { %v1610_v28 = vpop.permute.xlu1 %1609 }
 0x709   : > { %v3559_v21 = vpop.eup %3558 }
 0x70a   : > { %v1505_v24 = vmul.f32 %v3559_v21, %v3555_v12 }
 0x70c   : > { %v1506_v25 = vsub.f32 %v1493_v23, %v1505_v24 }
 0x70e   : > { %v1507_v26 = vpack.c.bf16 %v1506_v25, %v1506_v25 }
 0x710   : > { %3213 = vmatmul.mubr.msk.bf16.vlgmr.msra.gmra.mxu1 %vm1296_vm6, %v1507_v26 }
 0x711   : > { %3223 = vmatpush3.bf16.xpose.msra.mxu1 %v1617_v27  ;;  %3224 = vmatprep.mubr.msk.bf16.mxu1 %vm4047_vm0, %v4046_v0 }
 0x712   : > { %3234 = vmatprep.subr.bf16.mxu1 %v4046_v0 }
 0x718   : > { %3225 = vmatmul.mubr.msk.bf16.vlgmr.msra.gmra.mxu1 %vm1203_vm4, %v1610_v28 }
 0x719   : > { %3236 = vmatprep.mubr.msk.bf16.mxu1 %vm4047_vm0, %v4046_v0 }
 0x7c0   : > { %v1603_v29 = vpop.f32.mrf.mxu0 }
 0x7c1   : > { %v1659_v30 = vsel %vm1296_vm6, %v1603_v29, -inf }
 0x7c2   : > { %1660 = vmax.xlane.f32.xlu0 %v1659_v30  ;;  %v3220_v31 = vpop.f32.mrf.mxu0 }
 0x7c4   : > { %v1606_v32 = vpop.f32.mrf.mxu0 }
 0x7c6   : > { %v3221_v33 = vpop.f32.mrf.mxu0 }
 0x7d0   : > { %v4546_v34 = vpop.f32.mrf.mxu1 }
 0x7d2   : > { %v3214_v37 = vpop.f32.mrf.mxu1 }
 0x7d4   : > { %v1556_v38 = vpop.f32.mrf.mxu1 }
 0x7d6   : > { %v3215_v39 = vpop.f32.mrf.mxu1 }
 0x7d8   : > { %v1653_v40 = vpop.f32.mrf.mxu1 }
 0x7d9   : > { %v1671_v41 = vsel %vm1296_vm6, %v1653_v40, -inf }
 0x7da   : > { %1672 = vmax.xlane.f32.xlu1 %v1671_v41  ;;  %v3226_v42 = vpop.f32.mrf.mxu1 }
 0x7dc   : > { %v1656_v43 = vpop.f32.mrf.mxu1 }
 0x7de   : > { %v3227_v44 = vpop.f32.mrf.mxu1 }
 0x7eb   : > { %1685 = vrot.lane.b32.xlu1 %v4521_v8, %s4050_s18  ;;  %s3930_s18 = sshll.u32 %s4062_s15, 4  ;;  %s3931_s18 = int_to_ptr.vmem [resolvable:$false] %s3930_s18 }
 0x7ef   : > { %1785 = vrot.lane.b32.xlu1 %v4489_v35, %s4051_s20 }
 0x7f3   : > { %1733 = vrot.lane.b32.xlu1 %v4495_v36, %s4051_s20 }
 0x84b   : > { %v1661_v45 = vpop.xlane.xlu0 %1660 }
 0x84c   : > { %v1662_v46 = vsub.f32 %v1603_v29, %v1661_v45 }
 0x84e   : > { %v1663_v47 = vmul.f32 1.442695, %v1662_v46 }
 0x850   : > { %3560 = vpow2.f32 %v1663_v47 }
 0x85d   : > { %v3561_v48 = vpop.eup %3560 }
 0x85e   : > { %v1665_v49 = vsel %vm1296_vm6, %v3561_v48, 0.0 }
 0x85f   : > { %1666 = vadd.xlane.f32.xlu0 %v1665_v49 }
 0x863   : > { %v1673_v50 = vpop.xlane.xlu1 %1672 }
 0x864   : > { %v1674_v51 = vsub.f32 %v1653_v40, %v1673_v50 }
 0x866   : > { %v1675_v52 = vmul.f32 1.442695, %v1674_v51 }
 0x867   : > { %v1686_v53 = vpop.permute.xlu1 %1685 }
 0x868   : > { %3562 = vpow2.f32 %v1675_v52  ;;  %v1691_v55 = vsel %vm1326_vm5, %v1686_v53, 0 }
 0x869   : > { %3229 = vmatpush3.bf16.msra.mxu0 %v1691_v55 }
 0x86a   : > { %3240 = vmatprep.subr.bf16.mxu0 %v4046_v0 }
 0x86b   : > { %v1786_v62 = vpop.permute.xlu1 %1785 }
 0x86c   : > { %v1791_v7 = vsel %vm1203_vm4, %v1786_v62, 0 }
 0x86f   : > { %v1734_v1 = vpop.permute.xlu1 %1733 }
 0x875   : > { %v3563_v56 = vpop.eup %3562 }
 0x876   : > { %v1677_v57 = vsel %vm1296_vm6, %v3563_v56, 0.0 }
 0x877   : > { %1678 = vadd.xlane.f32.xlu0 %v1677_v57 }
 0x88d   : > { %1735 = vrot.lane.b32.xlu0 %v4481_v22, %s4051_s20 }
 0x891   : > { %1783 = vrot.lane.b32.xlu0 %v4476_v16, %s4051_s20 }
 0x8e8   : > { %v1667_v58 = vpop.xlane.xlu0 %1666 }
 0x8e9   : > { %3564 = vrcp.f32 %v1667_v58 }
 0x8f6   : > { %v3565_v63 = vpop.eup %3564 }
 0x8f7   : > { %v1670_v3 = vmul.f32 %v3565_v63, %v3561_v48 }
 0x900   : > { %v1679_v59 = vpop.xlane.xlu0 %1678 }
 0x901   : > { %3566 = vrcp.f32 %v1679_v59 }
 0x904   : > { %v1736_v60 = vpop.permute.xlu0 %1735 }
 0x905   : > { %v1741_v61 = vsel %vm1203_vm4, %v1736_v60, 0 }
 0x906   : > { %3235 = vmatpush3.bf16.xpose.msra.mxu1 %v1741_v61 }
 0x907   : > { %3246 = vmatprep.subr.bf16.mxu1 %v4046_v0 }
 0x908   : > { %v1784_v10 = vpop.permute.xlu0 %1783 }
 0x90d   : > { %3237 = vmatmul.mubr.msk.bf16.vlgmr.msra.gmra.mxu1 %vm1203_vm4, %v1734_v1 }
 0x90e   : > { %v3567_v2 = vpop.eup %3566  ;;  %3248 = vmatprep.mubr.msk.bf16.mxu1 %vm4047_vm0, %v4046_v0 }
 0x90f   : > { %v1682_v4 = vmul.f32 %v3567_v2, %v3563_v56 }
 0x911   : > { %v1683_v5 = vsub.f32 %v1670_v3, %v1682_v4 }
 0x913   : > { %v1684_v6 = vpack.c.bf16 %v1683_v5, %v1683_v5 }
 0x915   : > { %3231 = vmatmul.mubr.msk.bf16.vlgmr.msra.gmra.mxu0 %vm1296_vm6, %v1684_v6 }
 0x916   : > { %3241 = vmatpush3.bf16.xpose.msra.mxu0 %v1791_v7  ;;  %3242 = vmatprep.mubr.msk.bf16.mxu0 %vm4047_vm0, %v4046_v0 }
 0x917   : > { %3252 = vmatprep.subr.bf16.mxu0 %v4046_v0 }
 0x91d   : > { %3243 = vmatmul.mubr.msk.bf16.vlgmr.msra.gmra.mxu0 %vm1203_vm4, %v1784_v10 }
 0x91e   : > { %3254 = vmatprep.mubr.msk.bf16.mxu0 %vm4047_vm0, %v4046_v0 }
 0x9cd   : > { %v1777_v11 = vpop.f32.mrf.mxu1 }
 0x9ce   : > { %v1833_v12 = vsel %vm1296_vm6, %v1777_v11, -inf }
 0x9cf   : > { %1834 = vmax.xlane.f32.xlu1 %v1833_v12  ;;  %v3238_v13 = vpop.f32.mrf.mxu1 }
 0x9d1   : > { %v1780_v9 = vpop.f32.mrf.mxu1 }
 0x9d3   : > { %v3239_v14 = vpop.f32.mrf.mxu1 }
 0x9d5   : > { %v4577_v15 = vpop.f32.mrf.mxu0 }
 0x9d7   : > { %v3232_v17 = vpop.f32.mrf.mxu0 }
 0x9d9   : > { %v1730_v18 = vpop.f32.mrf.mxu0 }
 0x9db   : > { %v3233_v19 = vpop.f32.mrf.mxu0 }
 0x9dd   : > { %v1827_v20 = vpop.f32.mrf.mxu0 }
 0x9de   : > { %v1845_v21 = vsel %vm1296_vm6, %v1827_v20, -inf }
 0x9df   : > { %1846 = vmax.xlane.f32.xlu0 %v1845_v21  ;;  %v3244_v23 = vpop.f32.mrf.mxu0 }
 0x9e0   : > { %1909 = vrot.lane.b32.xlu1 %v4481_v22, %s4048_s6 }
 0x9e1   : > { %v1830_v24 = vpop.f32.mrf.mxu0 }
 0x9e3   : > { %v3245_v25 = vpop.f32.mrf.mxu0 }
 0xa58   : > { %v1835_v26 = vpop.xlane.xlu1 %1834 }
 0xa59   : > { %v1836_v27 = vsub.f32 %v1777_v11, %v1835_v26 }
 0xa5b   : > { %v1837_v28 = vmul.f32 1.442695, %v1836_v27 }
 0xa5c   : > { %v1910_v29 = vpop.permute.xlu1 %1909 }
 0xa5d   : > { %3568 = vpow2.f32 %v1837_v28  ;;  %v1915_v30 = vsel %vm1203_vm4, %v1910_v29, 0 }
 0xa5e   : > { %3253 = vmatpush3.bf16.xpose.msra.mxu0 %v1915_v30 }
 0xa5f   : > { %3264 = vmatprep.subr.bf16.mxu0 %v4046_v0 }
 0xa68   : > { %v1847_v31 = vpop.xlane.xlu0 %1846 }
 0xa69   : > { %v1848_v32 = vsub.f32 %v1827_v20, %v1847_v31 }
 0xa6a   : > { %v3569_v33 = vpop.eup %3568 }
 0xa6b   : > { %v1849_v37 = vmul.f32 1.442695, %v1848_v32  ;;  %v1839_v38 = vsel %vm1296_vm6, %v3569_v33, 0.0 }
 0xa6c   : > { %1840 = vadd.xlane.f32.xlu0 %v1839_v38 }
 0xa6d   : > { %3570 = vpow2.f32 %v1849_v37 }
 0xa7a   : > { %v3571_v39 = vpop.eup %3570 }
 0xa7b   : > { %v1851_v40 = vsel %vm1296_vm6, %v3571_v39, 0.0 }
 0xa7c   : > { %1852 = vadd.xlane.f32.xlu1 %v1851_v40 }
 0xa82   : > { %1859 = vrot.lane.b32.xlu0 %v4521_v8, %s4051_s20  ;;  %s4833_s20 = sld [smem:[#allocation48_spill]] }
 0xa86   : > { %1907 = vrot.lane.b32.xlu0 %v4495_v36, %s4048_s6 }
 0xa8d   : > { %1959 = vrot.lane.b32.xlu1 %v4489_v35, %s4048_s6 }
 0xa91   : > { %1957 = vrot.lane.b32.xlu1 %v4476_v16, %s4048_s6 }
 0xaf5   : > { %v1841_v41 = vpop.xlane.xlu0 %1840 }
 0xaf6   : > { %3572 = vrcp.f32 %v1841_v41 }
 0xaf9   : > { %v1860_v42 = vpop.permute.xlu0 %1859 }
 0xafa   : > { %v1865_v43 = vsel %vm1326_vm5, %v1860_v42, 0 }
 0xafb   : > { %3247 = vmatpush3.bf16.msra.mxu1 %v1865_v43 }
 0xafc   : > { %3258 = vmatprep.subr.bf16.mxu1 %v4046_v0 }
 0xafd   : > { %v1908_v44 = vpop.permute.xlu0 %1907 }
 0xafe   : > { %3255 = vmatmul.mubr.msk.bf16.vlgmr.msra.gmra.mxu0 %vm1203_vm4, %v1908_v44 }
 0xaff   : > { %3266 = vmatprep.mubr.msk.bf16.mxu0 %vm4047_vm0, %v4046_v0 }
 0xb03   : > { %v3573_v46 = vpop.eup %3572 }
 0xb04   : > { %v1844_v48 = vmul.f32 %v3573_v46, %v3569_v33 }
 0xb05   : > { %v1853_v45 = vpop.xlane.xlu1 %1852 }
 0xb06   : > { %3574 = vrcp.f32 %v1853_v45 }
 0xb09   : > { %v1960_v51 = vpop.permute.xlu1 %1959 }
 0xb0a   : > { %v1965_v53 = vsel %vm1203_vm4, %v1960_v51, 0 }
 0xb0d   : > { %v1958_v55 = vpop.permute.xlu1 %1957 }
 0xb13   : > { %v3575_v47 = vpop.eup %3574 }
 0xb14   : > { %v1856_v49 = vmul.f32 %v3575_v47, %v3571_v39 }
 0xb16   : > { %v1857_v50 = vsub.f32 %v1844_v48, %v1856_v49 }
 0xb18   : > { %v1858_v52 = vpack.c.bf16 %v1857_v50, %v1857_v50 }
 0xb1a   : > { %3249 = vmatmul.mubr.msk.bf16.vlgmr.msra.gmra.mxu1 %vm1296_vm6, %v1858_v52 }
 0xb1b   : > { %3259 = vmatpush3.bf16.xpose.msra.mxu1 %v1965_v53  ;;  %3260 = vmatprep.mubr.msk.bf16.mxu1 %vm4047_vm0, %v4046_v0 }
 0xb1c   : > { %3270 = vmatprep.subr.bf16.mxu1 %v4046_v0 }
 0xb22   : > { %3261 = vmatmul.mubr.msk.bf16.vlgmr.msra.gmra.mxu1 %vm1203_vm4, %v1958_v55 }
 0xb23   : > { %3272 = vmatprep.mubr.msk.bf16.mxu1 %vm4047_vm0, %v4046_v0 }
 0xbbe   : > { %v1951_v56 = vpop.f32.mrf.mxu0 }
 0xbbf   : > { %v2007_v57 = vsel %vm1296_vm6, %v1951_v56, -inf }
 0xbc0   : > { %2008 = vmax.xlane.f32.xlu0 %v2007_v57  ;;  %v3256_v58 = vpop.f32.mrf.mxu0 }
 0xbc2   : > { %v1954_v59 = vpop.f32.mrf.mxu0 }
 0xbc4   : > { %v3257_v60 = vpop.f32.mrf.mxu0 }
 0xbda   : > { %v4608_v61 = vpop.f32.mrf.mxu1 }
 0xbdc   : > { %v3250_v62 = vpop.f32.mrf.mxu1 }
 0xbde   : > { %v1904_v63 = vpop.f32.mrf.mxu1 }
 0xbe0   : > { %v3251_v1 = vpop.f32.mrf.mxu1 }
 0xbe2   : > { %v2001_v2 = vpop.f32.mrf.mxu1 }
 0xbe3   : > { %v2019_v3 = vsel %vm1296_vm6, %v2001_v2, -inf }
 0xbe4   : > { %2020 = vmax.xlane.f32.xlu1 %v2019_v3  ;;  %v3262_v4 = vpop.f32.mrf.mxu1 }
 0xbe6   : > { %v2004_v5 = vpop.f32.mrf.mxu1 }
 0xbe8   : > { %v3263_v6 = vpop.f32.mrf.mxu1 }
 0xbf5   : > { %2033 = vrot.lane.b32.xlu1 %v4521_v8, %s4048_s6  ;;  %s4061_s6 = smov 28  }
 0xbf9   : > { %2133 = vrot.lane.b32.xlu1 %v4489_v35, %s4052_s16 }
 0xbfd   : > { %2081 = vrot.lane.b32.xlu1 %v4495_v36, %s4052_s16 }
 0xc49   : > { %v2009_v7 = vpop.xlane.xlu0 %2008 }
 0xc4a   : > { %v2010_v10 = vsub.f32 %v1951_v56, %v2009_v7 }
 0xc4c   : > { %v2011_v11 = vmul.f32 1.442695, %v2010_v10 }
 0xc4e   : > { %3576 = vpow2.f32 %v2011_v11 }
 0xc5b   : > { %v3577_v12 = vpop.eup %3576 }
 0xc5c   : > { %v2013_v13 = vsel %vm1296_vm6, %v3577_v12, 0.0 }
 0xc5d   : > { %2014 = vadd.xlane.f32.xlu0 %v2013_v13 }
 0xc6d   : > { %v2021_v9 = vpop.xlane.xlu1 %2020 }
 0xc6e   : > { %v2022_v14 = vsub.f32 %v2001_v2, %v2021_v9 }
 0xc70   : > { %v2023_v17 = vmul.f32 1.442695, %v2022_v14 }
 0xc71   : > { %v2034_v18 = vpop.permute.xlu1 %2033 }
 0xc72   : > { %3578 = vpow2.f32 %v2023_v17  ;;  %v2039_v19 = vsel %vm1326_vm5, %v2034_v18, 0 }
 0xc73   : > { %3265 = vmatpush3.bf16.msra.mxu0 %v2039_v19 }
 0xc74   : > { %3276 = vmatprep.subr.bf16.mxu0 %v4046_v0 }
 0xc75   : > { %v2134_v27 = vpop.permute.xlu1 %2133 }
 0xc76   : > { %v2139_v38 = vsel %vm1203_vm4, %v2134_v27, 0 }
 0xc79   : > { %v2082_v29 = vpop.permute.xlu1 %2081 }
 0xc7f   : > { %v3579_v20 = vpop.eup %3578 }
 0xc80   : > { %v2025_v21 = vsel %vm1296_vm6, %v3579_v20, 0.0 }
 0xc81   : > { %2026 = vadd.xlane.f32.xlu0 %v2025_v21 }
 0xc97   : > { %2083 = vrot.lane.b32.xlu0 %v4481_v22, %s4052_s16 }
 0xc9b   : > { %2131 = vrot.lane.b32.xlu0 %v4476_v16, %s4052_s16 }
 0xce6   : > { %v2015_v23 = vpop.xlane.xlu0 %2014 }
 0xce7   : > { %3580 = vrcp.f32 %v2015_v23 }
 0xcf4   : > { %v3581_v28 = vpop.eup %3580 }
 0xcf5   : > { %v2018_v31 = vmul.f32 %v3581_v28, %v3577_v12 }
 0xd0a   : > { %v2027_v24 = vpop.xlane.xlu0 %2026 }
 0xd0b   : > { %3582 = vrcp.f32 %v2027_v24 }
 0xd0e   : > { %v2084_v25 = vpop.permute.xlu0 %2083 }
 0xd0f   : > { %v2089_v26 = vsel %vm1203_vm4, %v2084_v25, 0 }
 0xd10   : > { %3271 = vmatpush3.bf16.xpose.msra.mxu1 %v2089_v26 }
 0xd11   : > { %3282 = vmatprep.subr.bf16.mxu1 %v4046_v0 }
 0xd12   : > { %v2132_v39 = vpop.permute.xlu0 %2131 }
 0xd17   : > { %3273 = vmatmul.mubr.msk.bf16.vlgmr.msra.gmra.mxu1 %vm1203_vm4, %v2082_v29 }
 0xd18   : > { %v3583_v30 = vpop.eup %3582  ;;  %3284 = vmatprep.mubr.msk.bf16.mxu1 %vm4047_vm0, %v4046_v0 }
 0xd19   : > { %v2030_v32 = vmul.f32 %v3583_v30, %v3579_v20 }
 0xd1b   : > { %v2031_v33 = vsub.f32 %v2018_v31, %v2030_v32 }
 0xd1d   : > { %v2032_v37 = vpack.c.bf16 %v2031_v33, %v2031_v33 }
 0xd1f   : > { %3267 = vmatmul.mubr.msk.bf16.vlgmr.msra.gmra.mxu0 %vm1296_vm6, %v2032_v37 }
 0xd20   : > { %3277 = vmatpush3.bf16.xpose.msra.mxu0 %v2139_v38  ;;  %3278 = vmatprep.mubr.msk.bf16.mxu0 %vm4047_vm0, %v4046_v0 }
 0xd21   : > { %3288 = vmatprep.subr.bf16.mxu0 %v4046_v0 }
 0xd27   : > { %3279 = vmatmul.mubr.msk.bf16.vlgmr.msra.gmra.mxu0 %vm1203_vm4, %v2132_v39 }
 0xd28   : > { %3290 = vmatprep.mubr.msk.bf16.mxu0 %vm4047_vm0, %v4046_v0 }
 0xdd7   : > { %v2125_v40 = vpop.f32.mrf.mxu1 }
 0xdd8   : > { %v2181_v41 = vsel %vm1296_vm6, %v2125_v40, -inf }
 0xdd9   : > { %2182 = vmax.xlane.f32.xlu1 %v2181_v41  ;;  %v3274_v42 = vpop.f32.mrf.mxu1 }
 0xddb   : > { %v2128_v43 = vpop.f32.mrf.mxu1 }
 0xddd   : > { %v3275_v44 = vpop.f32.mrf.mxu1 }
 0xddf   : > { %v4639_v45 = vpop.f32.mrf.mxu0 }
 0xde1   : > { %v3268_v46 = vpop.f32.mrf.mxu0 }
 0xde3   : > { %v2078_v47 = vpop.f32.mrf.mxu0 }
 0xde5   : > { %v3269_v48 = vpop.f32.mrf.mxu0 }
 0xde7   : > { %v2175_v49 = vpop.f32.mrf.mxu0 }
 0xde8   : > { %v2193_v50 = vsel %vm1296_vm6, %v2175_v49, -inf }
 0xde9   : > { %2194 = vmax.xlane.f32.xlu0 %v2193_v50  ;;  %v3280_v51 = vpop.f32.mrf.mxu0 }
 0xdea   : > { %2257 = vrot.lane.b32.xlu1 %v4481_v22, %s4053_s24 }
 0xdeb   : > { %v2178_v52 = vpop.f32.mrf.mxu0 }
 0xded   : > { %v3281_v53 = vpop.f32.mrf.mxu0 }
 0xe62   : > { %v2183_v55 = vpop.xlane.xlu1 %2182 }
 0xe63   : > { %v2184_v56 = vsub.f32 %v2125_v40, %v2183_v55 }
 0xe65   : > { %v2185_v57 = vmul.f32 1.442695, %v2184_v56 }
 0xe66   : > { %v2258_v58 = vpop.permute.xlu1 %2257 }
 0xe67   : > { %3584 = vpow2.f32 %v2185_v57  ;;  %v2263_v59 = vsel %vm1203_vm4, %v2258_v58, 0 }
 0xe68   : > { %3289 = vmatpush3.bf16.xpose.msra.mxu0 %v2263_v59 }
 0xe69   : > { %3300 = vmatprep.subr.bf16.mxu0 %v4046_v0 }
 0xe72   : > { %v2195_v60 = vpop.xlane.xlu0 %2194 }
 0xe73   : > { %v2196_v62 = vsub.f32 %v2175_v49, %v2195_v60 }
 0xe74   : > { %v3585_v63 = vpop.eup %3584 }
 0xe75   : > { %v2197_v1 = vmul.f32 1.442695, %v2196_v62  ;;  %v2187_v2 = vsel %vm1296_vm6, %v3585_v63, 0.0 }
 0xe76   : > { %2188 = vadd.xlane.f32.xlu0 %v2187_v2 }
 0xe77   : > { %3586 = vpow2.f32 %v2197_v1 }
 0xe84   : > { %v3587_v3 = vpop.eup %3586 }
 0xe85   : > { %v2199_v4 = vsel %vm1296_vm6, %v3587_v3, 0.0 }
 0xe86   : > { %2200 = vadd.xlane.f32.xlu1 %v2199_v4 }
 0xe8c   : > { %2207 = vrot.lane.b32.xlu0 %v4521_v8, %s4052_s16 }
 0xe90   : > { %2255 = vrot.lane.b32.xlu0 %v4495_v36, %s4053_s24 }
 0xe97   : > { %2307 = vrot.lane.b32.xlu1 %v4489_v35, %s4053_s24 }
 0xe9b   : > { %2305 = vrot.lane.b32.xlu1 %v4476_v16, %s4053_s24 }
 0xeff   : > { %v2189_v5 = vpop.xlane.xlu0 %2188 }
 0xf00   : > { %3588 = vrcp.f32 %v2189_v5 }
 0xf03   : > { %v2208_v6 = vpop.permute.xlu0 %2207 }
 0xf04   : > { %v2213_v7 = vsel %vm1326_vm5, %v2208_v6, 0 }
 0xf05   : > { %3283 = vmatpush3.bf16.msra.mxu1 %v2213_v7 }
 0xf06   : > { %3294 = vmatprep.subr.bf16.mxu1 %v4046_v0 }
 0xf07   : > { %v2256_v10 = vpop.permute.xlu0 %2255 }
 0xf08   : > { %3291 = vmatmul.mubr.msk.bf16.vlgmr.msra.gmra.mxu0 %vm1203_vm4, %v2256_v10 }
 0xf09   : > { %3302 = vmatprep.mubr.msk.bf16.mxu0 %vm4047_vm0, %v4046_v0 }
 0xf0d   : > { %v3589_v12 = vpop.eup %3588 }
 0xf0e   : > { %v2192_v9 = vmul.f32 %v3589_v12, %v3585_v63 }
 0xf0f   : > { %v2201_v11 = vpop.xlane.xlu1 %2200 }
 0xf10   : > { %3590 = vrcp.f32 %v2201_v11 }
 0xf13   : > { %v2308_v18 = vpop.permute.xlu1 %2307 }
 0xf14   : > { %v2313_v20 = vsel %vm1203_vm4, %v2308_v18, 0 }
 0xf17   : > { %v2306_v21 = vpop.permute.xlu1 %2305 }
 0xf1d   : > { %v3591_v13 = vpop.eup %3590 }
 0xf1e   : > { %v2204_v14 = vmul.f32 %v3591_v13, %v3587_v3 }
 0xf20   : > { %v2205_v17 = vsub.f32 %v2192_v9, %v2204_v14 }
 0xf22   : > { %v2206_v19 = vpack.c.bf16 %v2205_v17, %v2205_v17 }
 0xf24   : > { %3285 = vmatmul.mubr.msk.bf16.vlgmr.msra.gmra.mxu1 %vm1296_vm6, %v2206_v19 }
 0xf25   : > { %3295 = vmatpush3.bf16.xpose.msra.mxu1 %v2313_v20  ;;  %3296 = vmatprep.mubr.msk.bf16.mxu1 %vm4047_vm0, %v4046_v0 }
 0xf26   : > { %3306 = vmatprep.subr.bf16.mxu1 %v4046_v0 }
 0xf2c   : > { %3297 = vmatmul.mubr.msk.bf16.vlgmr.msra.gmra.mxu1 %vm1203_vm4, %v2306_v21 }
 0xf2d   : > { %3308 = vmatprep.mubr.msk.bf16.mxu1 %vm4047_vm0, %v4046_v0 }
 0xfc8   : > { %v2299_v23 = vpop.f32.mrf.mxu0 }
 0xfc9   : > { %v2355_v24 = vsel %vm1296_vm6, %v2299_v23, -inf }
 0xfca   : > { %2356 = vmax.xlane.f32.xlu0 %v2355_v24  ;;  %v3292_v25 = vpop.f32.mrf.mxu0 }
 0xfcc   : > { %v2302_v26 = vpop.f32.mrf.mxu0 }
 0xfce   : > { %v3293_v27 = vpop.f32.mrf.mxu0 }
 0xfe4   : > { %v4670_v28 = vpop.f32.mrf.mxu1 }
 0xfe6   : > { %v3286_v29 = vpop.f32.mrf.mxu1 }
 0xfe8   : > { %v2252_v30 = vpop.f32.mrf.mxu1 }
 0xfea   : > { %v3287_v31 = vpop.f32.mrf.mxu1 }
 0xfec   : > { %v2349_v32 = vpop.f32.mrf.mxu1 }
 0xfed   : > { %v2367_v33 = vsel %vm1296_vm6, %v2349_v32, -inf }
 0xfee   : > { %2368 = vmax.xlane.f32.xlu1 %v2367_v33  ;;  %v3298_v37 = vpop.f32.mrf.mxu1 }
 0xff0   : > { %v2352_v38 = vpop.f32.mrf.mxu1 }
 0xff2   : > { %v3299_v39 = vpop.f32.mrf.mxu1 }
 0xfff   : > { %2381 = vrot.lane.b32.xlu1 %v4521_v8, %s4053_s24 }
0x1003   : > { %2481 = vrot.lane.b32.xlu1 %v4489_v35, %s4054_s14 }
0x1007   : > { %2429 = vrot.lane.b32.xlu1 %v4495_v36, %s4054_s14 }
0x1053   : > { %v2357_v40 = vpop.xlane.xlu0 %2356 }
0x1054   : > { %v2358_v41 = vsub.f32 %v2299_v23, %v2357_v40 }
0x1056   : > { %v2359_v42 = vmul.f32 1.442695, %v2358_v41 }
0x1058   : > { %3592 = vpow2.f32 %v2359_v42 }
0x1065   : > { %v3593_v43 = vpop.eup %3592 }
0x1066   : > { %v2361_v44 = vsel %vm1296_vm6, %v3593_v43, 0.0 }
0x1067   : > { %2362 = vadd.xlane.f32.xlu0 %v2361_v44 }
0x1077   : > { %v2369_v46 = vpop.xlane.xlu1 %2368 }
0x1078   : > { %v2370_v47 = vsub.f32 %v2349_v32, %v2369_v46 }
0x107a   : > { %v2371_v48 = vmul.f32 1.442695, %v2370_v47 }
0x107b   : > { %v2382_v49 = vpop.permute.xlu1 %2381 }
0x107c   : > { %3594 = vpow2.f32 %v2371_v48  ;;  %v2387_v50 = vsel %vm1326_vm5, %v2382_v49, 0 }
0x107d   : > { %3301 = vmatpush3.bf16.msra.mxu0 %v2387_v50 }
0x107e   : > { %3312 = vmatprep.subr.bf16.mxu0 %v4046_v0 }
0x107f   : > { %v2482_v56 = vpop.permute.xlu1 %2481 }
0x1080   : > { %v2487_v63 = vsel %vm1203_vm4, %v2482_v56, 0 }
0x1083   : > { %v2430_v58 = vpop.permute.xlu1 %2429 }
0x1089   : > { %v3595_v35 = vpop.eup %3594 }
0x108a   : > { %v2373_v36 = vsel %vm1296_vm6, %v3595_v35, 0.0 }
0x108b   : > { %2374 = vadd.xlane.f32.xlu0 %v2373_v36 }
0x10a1   : > { %2431 = vrot.lane.b32.xlu0 %v4481_v22, %s4054_s14 }
0x10a5   : > { %2479 = vrot.lane.b32.xlu0 %v4476_v16, %s4054_s14 }
0x10f0   : > { %v2363_v51 = vpop.xlane.xlu0 %2362 }
0x10f1   : > { %3596 = vrcp.f32 %v2363_v51 }
0x10fe   : > { %v3597_v57 = vpop.eup %3596 }
0x10ff   : > { %v2366_v16 = vmul.f32 %v3597_v57, %v3593_v43 }
0x1114   : > { %v2375_v52 = vpop.xlane.xlu0 %2374 }
0x1115   : > { %3598 = vrcp.f32 %v2375_v52 }
0x1118   : > { %v2432_v53 = vpop.permute.xlu0 %2431 }
0x1119   : > { %v2437_v55 = vsel %vm1203_vm4, %v2432_v53, 0 }
0x111a   : > { %3307 = vmatpush3.bf16.xpose.msra.mxu1 %v2437_v55 }
0x111b   : > { %3318 = vmatprep.subr.bf16.mxu1 %v4046_v0 }
0x111c   : > { %v2480_v1 = vpop.permute.xlu0 %2479 }
0x1121   : > { %3309 = vmatmul.mubr.msk.bf16.vlgmr.msra.gmra.mxu1 %vm1203_vm4, %v2430_v58  ;;  %v3037_v58 = vld [vmem:[%s4786_s13] ss:$0 sm:$0xff] }
0x1122   : > { %v3599_v59 = vpop.eup %3598  ;;  %3320 = vmatprep.mubr.msk.bf16.mxu1 %vm4047_vm0, %v4046_v0 }
0x1123   : > { %v2378_v22 = vmul.f32 %v3599_v59, %v3595_v35 }
0x1125   : > { %v2379_v60 = vsub.f32 %v2366_v16, %v2378_v22 }
0x1127   : > { %v2380_v62 = vpack.c.bf16 %v2379_v60, %v2379_v60 }
0x1129   : > { %3303 = vmatmul.mubr.msk.bf16.vlgmr.msra.gmra.mxu0 %vm1296_vm6, %v2380_v62 }
0x112a   : > { %3313 = vmatpush3.bf16.xpose.msra.mxu0 %v2487_v63  ;;  %3314 = vmatprep.mubr.msk.bf16.mxu0 %vm4047_vm0, %v4046_v0 }
0x112b   : > { %3324 = vmatprep.subr.bf16.mxu0 %v4046_v0 }
0x1131   : > { %3315 = vmatmul.mubr.msk.bf16.vlgmr.msra.gmra.mxu0 %vm1203_vm4, %v2480_v1 }
0x1132   : > { %3328 = vmatprep.mubr.msk.bf16.mxu0 %vm4047_vm0, %v4046_v0 }
0x11e1   : > { %v2473_v2 = vpop.f32.mrf.mxu1 }
0x11e2   : > { %v2529_v3 = vsel %vm1296_vm6, %v2473_v2, -inf }
0x11e3   : > { %2530 = vmax.xlane.f32.xlu1 %v2529_v3  ;;  %v3310_v4 = vpop.f32.mrf.mxu1 }
0x11e5   : > { %v2476_v5 = vpop.f32.mrf.mxu1 }
0x11e7   : > { %v3311_v6 = vpop.f32.mrf.mxu1 }
0x11e9   : > { %v2423_v7 = vpop.f32.mrf.mxu0 }
0x11eb   : > { %v3304_v10 = vpop.f32.mrf.mxu0 }
0x11ed   : > { %v2426_v11 = vpop.f32.mrf.mxu0 }
0x11ef   : > { %v3305_v12 = vpop.f32.mrf.mxu0 }
0x11f1   : > { %v2523_v13 = vpop.f32.mrf.mxu0 }
0x11f2   : > { %v2541_v9 = vsel %vm1296_vm6, %v2523_v13, -inf }
0x11f3   : > { %2542 = vmax.xlane.f32.xlu0 %v2541_v9  ;;  %v3316_v14 = vpop.f32.mrf.mxu0 }
0x11f5   : > { %v2526_v17 = vpop.f32.mrf.mxu0 }
0x11f7   : > { %v3317_v18 = vpop.f32.mrf.mxu0 }
0x11f8   : > { %v3041_v18 = vld [vmem:[%s4833_s20] ss:$0 sm:$0xff] }
0x126c   : > { %v2531_v19 = vpop.xlane.xlu1 %2530 }
0x126d   : > { %v2532_v20 = vsub.f32 %v2473_v2, %v2531_v19 }
0x126f   : > { %v2533_v21 = vmul.f32 1.442695, %v2532_v20 }
0x1271   : > { %3600 = vpow2.f32 %v2533_v21 }
0x127c   : > { %v2543_v23 = vpop.xlane.xlu0 %2542 }
0x127d   : > { %v2544_v24 = vsub.f32 %v2523_v13, %v2543_v23 }
0x127e   : > { %v3601_v25 = vpop.eup %3600 }
0x127f   : > { %v2545_v26 = vmul.f32 1.442695, %v2544_v24  ;;  %v2535_v27 = vsel %vm1296_vm6, %v3601_v25, 0.0 }
0x1280   : > { %2536 = vadd.xlane.f32.xlu0 %v2535_v27 }
0x1281   : > { %3602 = vpow2.f32 %v2545_v26 }
0x128e   : > { %v3603_v29 = vpop.eup %3602 }
0x128f   : > { %v2547_v30 = vsel %vm1296_vm6, %v3603_v29, 0.0 }
0x1290   : > { %2548 = vadd.xlane.f32.xlu1 %v2547_v30 }
0x1296   : > { %2555 = vrot.lane.b32.xlu0 %v4521_v8, %s4054_s14  ;;  %s4834_s14 = sld [smem:[#allocation49_spill]] }
0x129a   : > { %2612 = vrot.lane.b32.xlu0 %v4608_v61, %s4055_s19  ;;  %s3044_s19 = sshll.u32 %s4832_s28, 7  ;;  %s3932_s28 = scalar_lea.vmem %s3931_s18, 256 }
0x129c   : > { %v3042_v20 = vld [vmem:[%s4834_s14] ss:$0 sm:$0xff] }
0x129e   : > { %2620 = vrot.lane.b32.xlu0 %v4670_v28, %s4056_s27  ;;  %s704_s27 = scalar_lea.vmem [#allocation28], %s2982_s29 }
0x12a1   : > { %2604 = vrot.lane.b32.xlu1 %v4546_v34, %s4057_s2  ;;  %s2768_s2 = sshll.u32 %s704_s27, 4  ;;  %s2769_s2 = int_to_ptr.vmem [resolvable:$true] %s2768_s2 }
0x12a2   : > { %s3926_s10 = scalar_lea.vmem %s2769_s2, 128  ;;  %p3933_p3 = scmp.lt.s32.totalorder %s2769_s2, %s3931_s18 }
0x12a3   : > { %p3927_p6 = scmp.ne.s32.totalorder %s2769_s2, %s3926_s10  ;;  %p3934_p1 = scmp.lt.s32.totalorder %s3932_s28, %s3926_s10 }
0x12a5   : > { %2608 = vrot.lane.b32.xlu1 %v4577_v15, %s4058_s5  ;;  %v3542_v15 = vld [vmem:[#allocation26 + $0x8] sm:$0xff]   ;;  %p3928_p12 = pnand %p3927_p6, %p4339_p9  ;;  %p3935_p4 = por %p3934_p1, %p3933_p3 }
0x12a6   : > { %3325 = vmatpush3.bf16.msra.mxu0 %v3542_v15 }
0x12a7   : > { %3326 = vmatprep.subr.bf16.mxu0 %v4046_v0  ;;  %p3929_p7 = pneg %p3928_p12 }
0x12a9   : > { %2616 = vrot.lane.b32.xlu1 %v4639_v45, %s4059_s8  ;;  %v3543_v45 = vld [vmem:[#allocation26] sm:$0xff]   ;;  %p3936_p0 = pnand %p3935_p4, %p3929_p7 }
0x12aa   : > { %3327 = vmatpush3.bf16.msra.mxu0 %v3543_v45 }
0x12ad   : > { %2624 = vrot.lane.b32.xlu1 %v2423_v7, %s4060_s0  ;;  %s4835_s0 = sld [smem:[#allocation50_spill]] }
0x1309   : > { %v2537_v31 = vpop.xlane.xlu0 %2536 }
0x130a   : > { %3604 = vrcp.f32 %v2537_v31 }
0x130d   : > { %v2556_v32 = vpop.permute.xlu0 %2555 }
0x130e   : > { %v2561_v8 = vsel %vm1326_vm5, %v2556_v32, 0 }
0x130f   : > { %3319 = vmatpush3.bf16.msra.mxu1 %v2561_v8 }
0x1311   : > { %v2613_v47 = vpop.permute.xlu0 %2612 }
0x1315   : > { %v2621_v36 = vpop.permute.xlu0 %2620 }
0x1317   : > { %v3605_v28 = vpop.eup %3604 }
0x1318   : > { %v2540_v37 = vmul.f32 %v3605_v28, %v3601_v25 }
0x1319   : > { %v2549_v61 = vpop.xlane.xlu1 %2548 }
0x131a   : > { %3606 = vrcp.f32 %v2549_v61 }
0x131d   : > { %v2605_v44 = vpop.permute.xlu1 %2604 }
0x131e   : > { %v2631_v48 = vsel %vm1203_vm4, %v4511_v54, %v2605_v44 }
0x1321   : > { %v2609_v46 = vpop.permute.xlu1 %2608 }
0x1322   : > { %v2632_v50 = vsel %vm1296_vm6, %v2631_v48, %v2609_v46 }
0x1323   : > { %v2634_v35 = vsel %vm2633_vm7, %v2632_v50, %v2613_v47 }
0x1325   : > { %v2617_v49 = vpop.permute.xlu1 %2616 }
0x1326   : > { %v2636_v0 = vsel %vm736_vm1, %v2634_v35, %v2617_v49 }
0x1327   : > { %v3607_v33 = vpop.eup %3606  ;;  %v2638_v52 = vsel %vm2637_vm8, %v2636_v0, %v2621_v36 }
0x1328   : > { %v2552_v34 = vmul.f32 %v3607_v33, %v3603_v29 }
0x1329   : > { %v2625_v51 = vpop.permute.xlu1 %2624 }
0x132a   : > { %v2553_v38 = vsub.f32 %v2540_v37, %v2552_v34  ;;  %v2640_v53 = vsel %vm2639_vm9, %v2638_v52, %v2625_v51 }
0x132c   : > { %v2554_v39 = vpack.c.bf16 %v2553_v38, %v2553_v38 }
0x132e   : > { %3321 = vmatmul.mubr.msk.bf16.vlgmr.msra.gmra.mxu1 %vm1296_vm6, %v2554_v39 }
0x13ee   : > { %v2597_v40 = vpop.f32.mrf.mxu1 }
0x13ef   : > { %2628 = vrot.lane.b32.xlu0 %v2597_v40, %s4061_s6  ;;  %s2766_s6 = scalar_lea.hbm %s4835_s0, %s3044_s19 }
0x13f0   : > { %v3322_v41 = vpop.f32.mrf.mxu1 }
0x13f2   : > { %v2600_v42 = vpop.f32.mrf.mxu1 }
0x13f4   : > { %v3323_v43 = vpop.f32.mrf.mxu1 }
0x1461   : > { %v2629_v55 = vpop.permute.xlu0 %2628 }
0x1462   : > { %v2642_v56 = vsel %vm2641_vm10, %v2640_v53, %v2629_v55 }
0x1463   : > { %v2643_v57 = vpack.c.bf16 %v2642_v56, %v2642_v56 }
0x1465   : > { %2645 = vst.msk [vmem:[#allocation7] sm:$0xf] %vm904_vm3, %v2643_v57 }
0x146c   : > { %v2646_v54 = vld [vmem:[#allocation7] sm:$0xf] }
0x146d   : > { %3329 = vmatmul.mubr.msk.bf16.vlgmr.msra.gmra.mxu0 %vm859_vm2, %v2646_v54 }
0x152d   : > { %v2708_v59 = vpop.f32.mrf.mxu0 }
0x152e   : > { %v2709_v16 = vadd.f32 %v3037_v58, %v2708_v59 }
0x152f   : > { %v3330_v22 = vpop.f32.mrf.mxu0 }
0x1530   : > { %v2714_v60 = vsel %vm859_vm2, %v2709_v16, 0.0 }
0x1531   : > { %2715 = vadd.xlane.f32.xlu1 %v2714_v60  ;;  %v2711_v62 = vpop.f32.mrf.mxu0 }
0x1533   : > { %v3331_v63 = vpop.f32.mrf.mxu0 }
0x15ba   : > { %v2716_v1 = vpop.xlane.xlu1 %2715 }
0x15bb   : > { %v2718_v2 = vmul.f32 0.03125, %v2716_v1 }
0x15bd   : > { %v2719_v3 = vsub.f32 %v2709_v16, %v2718_v2 }
0x15bf   : > { %v2720_v4 = vmul.f32 %v2719_v3, %v2719_v3 }
0x15c1   : > { %v2721_v5 = vsel %vm859_vm2, %v2720_v4, 0.0 }
0x15c2   : > { %2722 = vadd.xlane.f32.xlu0 %v2721_v5 }
0x164b   : > { %v2723_v6 = vpop.xlane.xlu0 %2722 }
0x164c   : > { %v2724_v7 = vmul.f32 0.03125, %v2723_v6 }
0x164e   : > { %v2725_v10 = vadd.f32 1e-05, %v2724_v7 }
0x1650   : > { %3608 = vrsqrt.f32 %v2725_v10  ;;  %vm2728_vm11 = vcmp.eq.f32.partialorder %v2725_v10, inf  ;;  %v2731_v13 = vand.u32 2147483648, %v2725_v10  ;;  %vm2730_vm12 = vcmp.eq.f32.partialorder %v2725_v10, 0.0 }
0x165d   : > { %v3609_v11 = vpop.eup %3608 }
0x165e   : > { %v2727_v12 = vmul.f32 %v3609_v11, %v2725_v10 }
0x1660   : > { %v2729_v9 = vsel %vm2728_vm11, %v2725_v10, %v2727_v12 }
0x1661   : > { %v2732_v14 = vsel %vm2730_vm12, %v2731_v13, %v2729_v9 }
0x1662   : > { %3610 = vrcp.f32 %v2732_v14 }
0x166f   : > { %v3611_v17 = vpop.eup %3610 }
0x1670   : > { %v2735_v19 = vmul.f32 %v3611_v17, %v2719_v3 }
0x1672   : > { %v2743_v21 = vmul.f32 %v3041_v18, %v2735_v19 }
0x1674   : > { %v2751_v23 = vadd.f32 %v3042_v20, %v2743_v21 }
0x1676   : > { %2752 = vst.msk [vmem:[%s704_s27] sm:$0xff] %vm859_vm2, %v2751_v23 }
0x1677   : > { %3939 = shalt.err (!%p3936_p0)
}
0x1678   : > { %s3940_s29 = scalar_lea.hbm %s2766_s6, 128  ;;  %s3944_s16 = scalar_lea.hbm %s4835_s0, 256 }
0x1679   : > { %p3941_p2 = scmp.ne.s32.totalorder %s2766_s6, %s3940_s29  ;;  %p3945_p13 = scmp.lt.s32.totalorder %s2766_s6, %s4835_s0 }
0x167a   : > { %p3946_p10 = scmp.lt.s32.totalorder %s3944_s16, %s3940_s29 }
0x167b   : > { %p3942_p5 = pnand %p3941_p2, %p4339_p9 }
0x167c   : > { %p3947_p6 = por %p3946_p10, %p3945_p13 }
0x167d   : > { %p3943_p8 = pneg %p3942_p5 }
0x167f   : > { %p3948_p12 = pnand %p3947_p6, %p3943_p8 }
0x1681   : > { %3951 = shalt.err (!%p3948_p12)
}
0x1682   : > { %3378 = dma.vmem_to_hbm [thread:$0]  (%p4339_p9), %s2769_s2, 128, %s2766_s6, %s2754_s7  }
0x1683 PF: > { %s2780_s19 = sand.u32 1, %s4010_s21   ;;  %p4836_p7 = scmp.ge.s32.totalorder %s4030_s26, 2 }
0x1684   : > { %s2781_s27 = scalar_lea.sflag [#allocation10], %s2780_s19 }
0x1685   : > { %p3419_p3 = pnand %p4836_p7, %p4347_p11 }
0x1687   : > { %p3420_p1 = pneg %p3419_p3 }
0x1689   : > { %4005 = dma.done.wait (%p3420_p1), %s2781_s27, 128  }
0x168a   : > { %4007 = vsyncadd (%p3420_p1), %s2781_s27, 4294967168  ;;  %s38_s26 = sadd.s32 1, %s4030_s26   ;;  %s4837_s21 = smov %s4014_s22 }
0x168b   : > { %p35_p4 = scmp.ge.s32.totalorder %s38_s26, 4   ;;  %s4838_s22 = smov %s4018_s23 }
0x168c   : > { %s4839_s23 = smov %s4345_s17  ;;  %s4840_s24 = smov %s4026_s25 }
0x168d   : > { %s4841_s25 = smov %s4843_s30  ;;  %37 = sbr.rel (!%p35_p4) target bundleno = 26 (0x1a), region = 177 }
0x1692   :  { %2786 = vsyncpa [#allocation9], 1 }
0x1693   :  { %2788 = vsyncpa [#allocation9 + $0x1], 1 }
0x1694   :  { %2789 = vsyncpa [#allocation12], 1 }
0x1695   :  { %2790 = vsyncpa [#allocation15], 1 }
0x1696   :  { %2791 = vsyncpa [#allocation18], 1 }
0x1697   :  { %2792 = vsyncpa [#allocation21], 1 }
0x1698   :  { %2793 = vsyncpa [#allocation24], 1 }
0x1699   :  { %2794 = vsyncpa [#allocation27], 1 }
0x169a   :  { %2795 = vsyncpa [#allocation10], 1 }
0x169b   :  { %2797 = vsyncpa [#allocation10 + $0x1], 1 }

</bundles_post_ra>
